<compile_context>
chip_gen: v5e
topology: v5e:2x2
jax: 0.10.0
libtpu: 0.0.40
codegen_flags: <defaults>
</compile_context>

<pallas_src>
import math
from functools import partial

import jax
import jax.numpy as jnp
from jax.experimental import pallas as pl
from jax.experimental.pallas import tpu as pltpu


PARAM_ORDER = ("n1w", "n1b", "wqkv", "bqkv", "wout", "bout",
               "g1_wih", "g1_whh", "g1_bx", "g1_bhn",
               "n2w", "n2b", "l1w", "l1b", "l2w", "l2b",
               "g2_wih", "g2_whh", "g2_bx", "g2_bhn")


# ----------------------------- fused GTrXL kernel ---------------------------

def _gtrxl_kernel(x_ref,
                  n1w_ref, n1b_ref, wqkv_ref, bqkv_ref, wout_ref, bout_ref,
                  g1_wih_ref, g1_whh_ref, g1_bx_ref, g1_bhn_ref,
                  n2w_ref, n2b_ref, l1w_ref, l1b_ref, l2w_ref, l2b_ref,
                  g2_wih_ref, g2_whh_ref, g2_bx_ref, g2_bhn_ref,
                  out_ref, p3_s, y_s,
                  *, S, B, D, nheads, eps):
    hd = D // nheads
    l = pl.program_id(0)

    def bf(v):
        return v.astype(jnp.bfloat16)

    # Layer 0 reads the model input; later layers read the resident activation.
    @pl.when(l == 0)
    def _():
        out_ref[...] = x_ref[...]

    x = out_ref[...].astype(jnp.float32)                 # (B*S, D), batch-major rows

    # GRU initial hidden state: h0[s] = sum_b src[s, b, :]  (pre-norm input)
    def h0_body(b, acc):
        rb = pl.multiple_of(b * S, S)
        return acc + out_ref[pl.ds(rb, S), :].astype(jnp.float32)
    h = jax.lax.fori_loop(1, B, h0_body, x[0:S, :])

    def layer_norm(v, w, bias):
        mean = jnp.mean(v, axis=-1, keepdims=True)
        c = v - mean
        var = jnp.mean(c * c, axis=-1, keepdims=True)
        return c * jax.lax.rsqrt(var + eps) * w + bias

    # ---- LayerNorm1 + fused QKV projection (1/sqrt(hd) pre-folded into Wq/bq) ----
    xn = layer_norm(x, n1w_ref[...], n1b_ref[...])
    p3_s[...] = (jnp.dot(bf(xn), wqkv_ref[...],
                         preferred_element_type=jnp.float32) + bqkv_ref[...])

    # ---- multi-head self-attention: heads written into lane slabs of y_s ----
    qkt_dims = (((1,), (1,)), ((), ()))                  # contract last dims: Q @ K^T
    def attn_body(b, carry):
        rb = pl.multiple_of(b * S, S)
        for hh in range(nheads):                         # short fixed unroll
            q = p3_s[pl.ds(rb, S), hh * hd:(hh + 1) * hd]
            k = p3_s[pl.ds(rb, S), D + hh * hd:D + (hh + 1) * hd]
            v = p3_s[pl.ds(rb, S), 2 * D + hh * hd:2 * D + (hh + 1) * hd]
            s = jax.lax.dot_general(bf(q), bf(k), qkt_dims,
                                    preferred_element_type=jnp.float32)
            s = s - jnp.max(s, axis=-1, keepdims=True)
            p = jnp.exp(s)
            p = p * pl.reciprocal(jnp.sum(p, axis=-1, keepdims=True), approx=True)
            o = jnp.dot(bf(p), bf(v), preferred_element_type=jnp.float32)   # (S, hd)
            y_s[pl.ds(rb, S), hh * hd:(hh + 1) * hd] = o
        return carry
    jax.lax.fori_loop(0, B, attn_body, 0)

    # single out-projection matmul: full-D contraction over all B*S rows
    attn = (jnp.dot(bf(y_s[...]), wout_ref[...],
                    preferred_element_type=jnp.float32) + bout_ref[...])

    def gru(x_in, h0, wih_ref, whh_ref, bx_ref, bhn_ref, dst_ref):
        # Hoisted input projection; bx already contains b_ih + [b_hr, b_hz, 0].
        p3_s[...] = (jnp.dot(bf(x_in), wih_ref[...],
                             preferred_element_type=jnp.float32) + bx_ref[...])
        whh = whh_ref[...]
        bhn = bhn_ref[...]

        def step(t, hcur):
            rt = pl.multiple_of(t * S, S)
            xp = p3_s[pl.ds(rt, S), :]                                   # (S, 3D)
            hp = jnp.dot(bf(hcur), whh, preferred_element_type=jnp.float32)
            r = jax.nn.sigmoid(xp[:, 0:D] + hp[:, 0:D])
            z = jax.nn.sigmoid(xp[:, D:2 * D] + hp[:, D:2 * D])
            n = jnp.tanh(xp[:, 2 * D:3 * D] + r * (hp[:, 2 * D:3 * D] + bhn))
            hnew = (1.0 - z) * n + z * hcur
            dst_ref[pl.ds(rt, S), :] = hnew.astype(dst_ref.dtype)
            return hnew

        return jax.lax.fori_loop(0, B, step, h0)

    # ---- GRU1 (outputs into y_s) -> LayerNorm2 -> FFN -> GRU2 (into out_ref) ----
    h = gru(attn, h, g1_wih_ref, g1_whh_ref, g1_bx_ref, g1_bhn_ref, y_s)
    y1n = layer_norm(y_s[...], n2w_ref[...], n2b_ref[...])
    f = jnp.maximum(jnp.dot(bf(y1n), l1w_ref[...],
                            preferred_element_type=jnp.float32) + l1b_ref[...], 0.0)
    f = jnp.maximum(jnp.dot(bf(f), l2w_ref[...],
                            preferred_element_type=jnp.float32) + l2b_ref[...], 0.0)
    gru(f, h, g2_wih_ref, g2_whh_ref, g2_bx_ref, g2_bhn_ref, out_ref)


def gtrxl_layers(x2d, stacked, *, L, S, B, D, nheads, eps):
    args = (x2d,) + tuple(stacked[k] for k in PARAM_ORDER)
    in_specs = [pl.BlockSpec((B * S, D), lambda l: (0, 0))]
    for k in PARAM_ORDER:
        r, c = stacked[k].shape[1:]
        in_specs.append(pl.BlockSpec((None, r, c), lambda l: (l, 0, 0)))
    return pl.pallas_call(
        partial(_gtrxl_kernel, S=S, B=B, D=D, nheads=nheads, eps=eps),
        out_shape=jax.ShapeDtypeStruct((B * S, D), x2d.dtype),
        grid=(L,),
        in_specs=in_specs,
        out_specs=pl.BlockSpec((B * S, D), lambda l: (0, 0)),
        scratch_shapes=[pltpu.VMEM((B * S, 3 * D), jnp.float32),   # qkv / GRU xp
                        pltpu.VMEM((B * S, D), jnp.float32)],      # heads / GRU1 out
        compiler_params=pltpu.CompilerParams(
            dimension_semantics=("arbitrary",),
            vmem_limit_bytes=48 * 1024 * 1024),
    )(*args)


# ----------------------------- parameter prep -------------------------------

def prepare_layers(layers, nheads):
    """PyTorch-layout params -> stacked (L, ...) kernel-ready (fused, bf16) params."""
    D = layers[0]["norm1_w"].shape[0]
    hd = D // nheads
    scale = 1.0 / math.sqrt(hd)
    per = []
    for p in layers:
        w_in = p["attn"]["in_proj_weight"]        # (3D, D) = [Wq; Wk; Wv]
        b_in = p["attn"]["in_proj_bias"]          # (3D,)
        wq, wk, wv = w_in[:D], w_in[D:2 * D], w_in[2 * D:]
        bq, bk, bv = b_in[:D], b_in[D:2 * D], b_in[2 * D:]
        wqkv = jnp.concatenate([wq * scale, wk, wv], axis=0).T            # (D, 3D)
        bqkv = jnp.concatenate([bq * scale, bk, bv]).reshape(1, 3 * D)

        def prep_gru(g):
            bih, bhh = g["b_ih"], g["b_hh"]
            # fold r/z hidden biases into the hoisted input projection bias
            bx = (bih + jnp.concatenate([bhh[:2 * D],
                                         jnp.zeros((D,), bih.dtype)])).reshape(1, 3 * D)
            return (g["w_ih"].T.astype(jnp.bfloat16),
                    g["w_hh"].T.astype(jnp.bfloat16),
                    bx,
                    bhh[2 * D:3 * D].reshape(1, D))

        g1 = prep_gru(p["gru1"])
        g2 = prep_gru(p["gru2"])
        per.append({
            "n1w": p["norm1_w"].reshape(1, D), "n1b": p["norm1_b"].reshape(1, D),
            "wqkv": wqkv.astype(jnp.bfloat16), "bqkv": bqkv,
            "wout": p["attn"]["out_proj_weight"].T.astype(jnp.bfloat16),
            "bout": p["attn"]["out_proj_bias"].reshape(1, D),
            "g1_wih": g1[0], "g1_whh": g1[1], "g1_bx": g1[2], "g1_bhn": g1[3],
            "n2w": p["norm2_w"].reshape(1, D), "n2b": p["norm2_b"].reshape(1, D),
            "l1w": p["lin1_w"].T.astype(jnp.bfloat16), "l1b": p["lin1_b"].reshape(1, -1),
            "l2w": p["lin2_w"].T.astype(jnp.bfloat16), "l2b": p["lin2_b"].reshape(1, -1),
            "g2_wih": g2[0], "g2_whh": g2[1], "g2_bx": g2[2], "g2_bhn": g2[3],
        })
    return {k: jnp.stack([d[k] for d in per], axis=0) for k in per[0]}


def make_pe(max_len, d_model):
    position = jnp.arange(max_len, dtype=jnp.float32)[:, None]
    div_term = jnp.exp(jnp.arange(0, d_model, 2, dtype=jnp.float32)
                       * (-math.log(10000.0) / d_model))
    pe = jnp.zeros((max_len, d_model), dtype=jnp.float32)
    pe = pe.at[:, 0::2].set(jnp.sin(position * div_term))
    pe = pe.at[:, 1::2].set(jnp.cos(position * div_term))
    return pe[:, None, :]  # (max_len, 1, d_model)


# ----------------------------- model forward --------------------------------

def gtrxl_forward(x, stacked, pe, nheads, eps=1e-5):
    S, B, D = x.shape
    L = stacked["wqkv"].shape[0]
    x = x + pe[:S]                                      # PositionalEncoding (eval: no dropout)
    # batch-major internal layout; one transpose in, one out for the whole model
    xb = jnp.transpose(x, (1, 0, 2)).reshape(B * S, D)
    yb = gtrxl_layers(xb, stacked, L=L, S=S, B=B, D=D, nheads=nheads, eps=eps)
    return jnp.transpose(yb.reshape(B, S, D), (1, 0, 2))


def init_params(key, d_model, nheads, transformer_layers, hidden_dims):
    def u(k, shape, scale=0.1):
        return jax.random.uniform(k, shape, jnp.float32, -scale, scale)

    layers = []
    for lk in jax.random.split(key, transformer_layers):
        ks = jax.random.split(lk, 16)
        layers.append({
            "norm1_w": jnp.ones((d_model,), jnp.float32),
            "norm1_b": jnp.zeros((d_model,), jnp.float32),
            "norm2_w": jnp.ones((d_model,), jnp.float32),
            "norm2_b": jnp.zeros((d_model,), jnp.float32),
            "attn": {
                "in_proj_weight": u(ks[0], (3 * d_model, d_model)),
                "in_proj_bias": u(ks[1], (3 * d_model,)),
                "out_proj_weight": u(ks[2], (d_model, d_model)),
                "out_proj_bias": u(ks[3], (d_model,)),
            },
            "gru1": {
                "w_ih": u(ks[4], (3 * d_model, d_model)),
                "w_hh": u(ks[5], (3 * d_model, d_model)),
                "b_ih": u(ks[6], (3 * d_model,)),
                "b_hh": u(ks[7], (3 * d_model,)),
            },
            "gru2": {
                "w_ih": u(ks[8], (3 * d_model, d_model)),
                "w_hh": u(ks[9], (3 * d_model, d_model)),
                "b_ih": u(ks[10], (3 * d_model,)),
                "b_hh": u(ks[11], (3 * d_model,)),
            },
            "lin1_w": u(ks[12], (hidden_dims, d_model)),
            "lin1_b": u(ks[13], (hidden_dims,)),
            "lin2_w": u(ks[14], (d_model, hidden_dims)),
            "lin2_b": u(ks[15], (d_model,)),
        })
    return {"pe": make_pe(1024, d_model), "layers": layers}


if __name__ == "__main__":
    d_model, nheads, transformer_layers, hidden_dims = 32, 4, 2, 64
    S, B = 8, 2  # (seq, batch) — batch_first=False

    key = jax.random.PRNGKey(0)
    kx, kp = jax.random.split(key)
    x = jax.random.normal(kx, (S, B, d_model), jnp.float32)
    params = init_params(kp, d_model, nheads, transformer_layers, hidden_dims)
    stacked = prepare_layers(params["layers"], nheads)

    fwd = jax.jit(partial(gtrxl_forward, nheads=nheads))
    out = fwd(x, stacked, params["pe"])
    out = jax.block_until_ready(out)
    assert out.shape == (S, B, d_model)
    assert bool(jnp.all(jnp.isfinite(out)))
    print("KERNEL_OK")
</pallas_src>

<mosaic_0001>
module attributes {stable_mosaic.version = 11 : i64} {
  func.func @_gtrxl_kernel(%arg0: i32, %arg1: memref<16x32xf32, #tpu.memory_space<vmem>>, %arg2: memref<1x1x32xf32, #tpu.memory_space<vmem>>, %arg3: memref<1x1x32xf32, #tpu.memory_space<vmem>>, %arg4: memref<1x32x96xbf16, #tpu.memory_space<vmem>>, %arg5: memref<1x1x96xf32, #tpu.memory_space<vmem>>, %arg6: memref<1x32x32xbf16, #tpu.memory_space<vmem>>, %arg7: memref<1x1x32xf32, #tpu.memory_space<vmem>>, %arg8: memref<1x32x96xbf16, #tpu.memory_space<vmem>>, %arg9: memref<1x32x96xbf16, #tpu.memory_space<vmem>>, %arg10: memref<1x1x96xf32, #tpu.memory_space<vmem>>, %arg11: memref<1x1x32xf32, #tpu.memory_space<vmem>>, %arg12: memref<1x1x32xf32, #tpu.memory_space<vmem>>, %arg13: memref<1x1x32xf32, #tpu.memory_space<vmem>>, %arg14: memref<1x32x64xbf16, #tpu.memory_space<vmem>>, %arg15: memref<1x1x64xf32, #tpu.memory_space<vmem>>, %arg16: memref<1x64x32xbf16, #tpu.memory_space<vmem>>, %arg17: memref<1x1x32xf32, #tpu.memory_space<vmem>>, %arg18: memref<1x32x96xbf16, #tpu.memory_space<vmem>>, %arg19: memref<1x32x96xbf16, #tpu.memory_space<vmem>>, %arg20: memref<1x1x96xf32, #tpu.memory_space<vmem>>, %arg21: memref<1x1x32xf32, #tpu.memory_space<vmem>>, %arg22: memref<16x32xf32, #tpu.memory_space<vmem>>, %arg23: memref<16x96xf32, #tpu.memory_space<vmem>>, %arg24: memref<16x32xf32, #tpu.memory_space<vmem>>) attributes {dimension_semantics = [#tpu.dimension_semantics<arbitrary>], iteration_bounds = array<i64: 2>, scalar_prefetch = 0 : i64, scratch_operands = 2 : i64, tpu.core_type = #tpu.core_type<tc>, window_params = [{pipeline_mode = #tpu.pipeline_mode<synchronous>, transform_indices = @transform_0, window_bounds = array<i64: 16, 32>}, {transform_indices = @transform_1, window_bounds = array<i64: 1, 1, 32>}, {transform_indices = @transform_2, window_bounds = array<i64: 1, 1, 32>}, {transform_indices = @transform_3, window_bounds = array<i64: 1, 32, 96>}, {transform_indices = @transform_4, window_bounds = array<i64: 1, 1, 96>}, {transform_indices = @transform_5, window_bounds = array<i64: 1, 32, 32>}, {transform_indices = @transform_6, window_bounds = array<i64: 1, 1, 32>}, {transform_indices = @transform_7, window_bounds = array<i64: 1, 32, 96>}, {transform_indices = @transform_8, window_bounds = array<i64: 1, 32, 96>}, {transform_indices = @transform_9, window_bounds = array<i64: 1, 1, 96>}, {transform_indices = @transform_10, window_bounds = array<i64: 1, 1, 32>}, {transform_indices = @transform_11, window_bounds = array<i64: 1, 1, 32>}, {transform_indices = @transform_12, window_bounds = array<i64: 1, 1, 32>}, {transform_indices = @transform_13, window_bounds = array<i64: 1, 32, 64>}, {transform_indices = @transform_14, window_bounds = array<i64: 1, 1, 64>}, {transform_indices = @transform_15, window_bounds = array<i64: 1, 64, 32>}, {transform_indices = @transform_16, window_bounds = array<i64: 1, 1, 32>}, {transform_indices = @transform_17, window_bounds = array<i64: 1, 32, 96>}, {transform_indices = @transform_18, window_bounds = array<i64: 1, 32, 96>}, {transform_indices = @transform_19, window_bounds = array<i64: 1, 1, 96>}, {transform_indices = @transform_20, window_bounds = array<i64: 1, 1, 32>}, {pipeline_mode = #tpu.pipeline_mode<synchronous>, transform_indices = @transform_21, window_bounds = array<i64: 16, 32>}]} {
    %c0_i32 = arith.constant 0 : i32
    %0 = arith.cmpi eq, %arg0, %c0_i32 : i32
    %1 = arith.extui %0 : i1 to i32
    %c0_i32_0 = arith.constant 0 : i32
    %2 = arith.cmpi ne, %1, %c0_i32_0 : i32
    scf.if %2 {
      %c0_102 = arith.constant 0 : index
      %c0_103 = arith.constant 0 : index
      %128 = vector.load %arg1[%c0_102, %c0_103] : memref<16x32xf32, #tpu.memory_space<vmem>>, vector<16x32xf32>
      %c0_104 = arith.constant 0 : index
      %c0_105 = arith.constant 0 : index
      %129 = vector.load %arg22[%c0_104, %c0_105] : memref<16x32xf32, #tpu.memory_space<vmem>>, vector<16x32xf32>
      tpu.vector_store %arg22[%c0_104, %c0_105], %128 {strides = array<i32>} : memref<16x32xf32, #tpu.memory_space<vmem>>, vector<16x32xf32>,
    } else {
    }
    %c0 = arith.constant 0 : index
    %c0_1 = arith.constant 0 : index
    %3 = vector.load %arg22[%c0, %c0_1] : memref<16x32xf32, #tpu.memory_space<vmem>>, vector<16x32xf32>
    %4 = vector.extract_strided_slice %3 {offsets = [0, 0], sizes = [8, 32], strides = [1, 1]} : vector<16x32xf32> to vector<8x32xf32>
    %c1_i32 = arith.constant 1 : i32
    %c8_i32 = arith.constant 8 : i32
    %5 = arith.muli %c1_i32, %c8_i32 : i32
    %6 = tpu.assume_multiple %5, 8 : i32
    %7 = arith.index_cast %6 : i32 to index
    %c0_2 = arith.constant 0 : index
    %8 = vector.load %arg22[%7, %c0_2] : memref<16x32xf32, #tpu.memory_space<vmem>>, vector<8x32xf32>
    %9 = arith.addf %4, %8 : vector<8x32xf32>
    %c1_i32_3 = arith.constant 1 : i32
    %c0_4 = arith.constant 0 : index
    %c0_5 = arith.constant 0 : index
    %c0_6 = arith.constant 0 : index
    %10 = vector.load %arg2[%c0_4, %c0_5, %c0_6] : memref<1x1x32xf32, #tpu.memory_space<vmem>>, vector<1x1x32xf32>
    %11 = vector.shape_cast %10 : vector<1x1x32xf32> to vector<1x32xf32>
    %c0_7 = arith.constant 0 : index
    %c0_8 = arith.constant 0 : index
    %c0_9 = arith.constant 0 : index
    %12 = vector.load %arg3[%c0_7, %c0_8, %c0_9] : memref<1x1x32xf32, #tpu.memory_space<vmem>>, vector<1x1x32xf32>
    %13 = vector.shape_cast %12 : vector<1x1x32xf32> to vector<1x32xf32>
    %cst = arith.constant dense<0.000000e+00> : vector<16xf32>
    %14 = vector.multi_reduction <add>, %3, %cst [1] : vector<16x32xf32> to vector<16xf32>
    %15 = vector.shape_cast %14 : vector<16xf32> to vector<16x1xf32>
    %cst_10 = arith.constant 3.200000e+01 : f32
    %16 = vector.broadcast %cst_10 : f32 to vector<16x1xf32>
    %17 = arith.divf %15, %16 : vector<16x1xf32>
    %18 = vector.broadcast %17 : vector<16x1xf32> to vector<16x32xf32>
    %19 = arith.subf %3, %18 : vector<16x32xf32>
    %20 = arith.mulf %19, %19 : vector<16x32xf32>
    %cst_11 = arith.constant dense<0.000000e+00> : vector<16xf32>
    %21 = vector.multi_reduction <add>, %20, %cst_11 [1] : vector<16x32xf32> to vector<16xf32>
    %22 = vector.shape_cast %21 : vector<16xf32> to vector<16x1xf32>
    %cst_12 = arith.constant 3.200000e+01 : f32
    %23 = vector.broadcast %cst_12 : f32 to vector<16x1xf32>
    %24 = arith.divf %22, %23 : vector<16x1xf32>
    %cst_13 = arith.constant 9.99999974E-6 : f32
    %25 = vector.broadcast %cst_13 : f32 to vector<16x1xf32>
    %26 = arith.addf %24, %25 : vector<16x1xf32>
    %27 = math.rsqrt %26 : vector<16x1xf32>
    %28 = vector.broadcast %27 : vector<16x1xf32> to vector<16x32xf32>
    %29 = arith.mulf %19, %28 : vector<16x32xf32>
    %30 = vector.broadcast %11 : vector<1x32xf32> to vector<16x32xf32>
    %31 = arith.mulf %29, %30 : vector<16x32xf32>
    %32 = vector.broadcast %13 : vector<1x32xf32> to vector<16x32xf32>
    %33 = arith.addf %31, %32 : vector<16x32xf32>
    %34 = arith.truncf %33 : vector<16x32xf32> to vector<16x32xbf16>
    %c0_14 = arith.constant 0 : index
    %c0_15 = arith.constant 0 : index
    %c0_16 = arith.constant 0 : index
    %35 = vector.load %arg4[%c0_14, %c0_15, %c0_16] : memref<1x32x96xbf16, #tpu.memory_space<vmem>>, vector<1x32x96xbf16>
    %36 = vector.shape_cast %35 : vector<1x32x96xbf16> to vector<32x96xbf16>
    %cst_17 = arith.constant dense<0.000000e+00> : vector<16x96xf32>
    %37 = tpu.matmul %34, %36, %cst_17 {dimension_numbers = #tpu.dot_dimension_numbers<[1], [0], [0], [1], [0, 0, 1, 1], [], []>} : vector<16x32xbf16>, vector<32x96xbf16>, vector<16x96xf32> -> vector<16x96xf32>
    %c0_18 = arith.constant 0 : index
    %c0_19 = arith.constant 0 : index
    %c0_20 = arith.constant 0 : index
    %38 = vector.load %arg5[%c0_18, %c0_19, %c0_20] : memref<1x1x96xf32, #tpu.memory_space<vmem>>, vector<1x1x96xf32>
    %39 = vector.shape_cast %38 : vector<1x1x96xf32> to vector<1x96xf32>
    %40 = vector.broadcast %39 : vector<1x96xf32> to vector<16x96xf32>
    %41 = arith.addf %37, %40 : vector<16x96xf32>
    %c0_21 = arith.constant 0 : index
    %c0_22 = arith.constant 0 : index
    %42 = vector.load %arg23[%c0_21, %c0_22] : memref<16x96xf32, #tpu.memory_space<vmem>>, vector<16x96xf32>
    tpu.vector_store %arg23[%c0_21, %c0_22], %41 {strides = array<i32>} : memref<16x96xf32, #tpu.memory_space<vmem>>, vector<16x96xf32>,
    %c0_i32_23 = arith.constant 0 : i32
    %c2_i32 = arith.constant 2 : i32
    %43 = arith.addi %c0_i32_23, %c2_i32 : i32
    %c1_i32_24 = arith.constant 1 : i32
    scf.for %arg25 = %c0_i32_23 to %43 step %c1_i32_24  : i32 {
      %c8_i32_102 = arith.constant 8 : i32
      %128 = arith.muli %arg25, %c8_i32_102 : i32
      %129 = tpu.assume_multiple %128, 8 : i32
      %130 = arith.index_cast %129 : i32 to index
      %c0_103 = arith.constant 0 : index
      %131 = vector.load %arg23[%130, %c0_103] : memref<16x96xf32, #tpu.memory_space<vmem>>, vector<8x8xf32>
      %132 = arith.index_cast %129 : i32 to index
      %c32 = arith.constant 32 : index
      %133 = vector.load %arg23[%132, %c32] : memref<16x96xf32, #tpu.memory_space<vmem>>, vector<8x8xf32>
      %134 = arith.index_cast %129 : i32 to index
      %c64 = arith.constant 64 : index
      %135 = vector.load %arg23[%134, %c64] : memref<16x96xf32, #tpu.memory_space<vmem>>, vector<8x8xf32>
      %136 = arith.truncf %131 : vector<8x8xf32> to vector<8x8xbf16>
      %137 = arith.truncf %133 : vector<8x8xf32> to vector<8x8xbf16>
      %cst_104 = arith.constant dense<0.000000e+00> : vector<8x8xf32>
      %138 = tpu.matmul %136, %137, %cst_104 {dimension_numbers = #tpu.dot_dimension_numbers<[1], [1], [0], [0], [0, 0, 1, 0], [], []>} : vector<8x8xbf16>, vector<8x8xbf16>, vector<8x8xf32> -> vector<8x8xf32>
      %cst_105 = arith.constant dense<0xFF800000> : vector<8xf32>
      %139 = vector.multi_reduction <maximumf>, %138, %cst_105 [1] : vector<8x8xf32> to vector<8xf32>
      %140 = vector.shape_cast %139 : vector<8xf32> to vector<8x1xf32>
      %141 = vector.broadcast %140 : vector<8x1xf32> to vector<8x8xf32>
      %142 = arith.subf %138, %141 : vector<8x8xf32>
      %143 = math.exp %142 : vector<8x8xf32>
      %cst_106 = arith.constant dense<0.000000e+00> : vector<8xf32>
      %144 = vector.multi_reduction <add>, %143, %cst_106 [1] : vector<8x8xf32> to vector<8xf32>
      %145 = vector.shape_cast %144 : vector<8xf32> to vector<8x1xf32>
      %146 = tpu.reciprocal %145 {approx = true} : vector<8x1xf32> -> vector<8x1xf32>
      %147 = vector.broadcast %146 : vector<8x1xf32> to vector<8x8xf32>
      %148 = arith.mulf %143, %147 : vector<8x8xf32>
      %149 = arith.truncf %148 : vector<8x8xf32> to vector<8x8xbf16>
      %150 = arith.truncf %135 : vector<8x8xf32> to vector<8x8xbf16>
      %cst_107 = arith.constant dense<0.000000e+00> : vector<8x8xf32>
      %151 = tpu.matmul %149, %150, %cst_107 {dimension_numbers = #tpu.dot_dimension_numbers<[1], [0], [0], [1], [0, 0, 1, 1], [], []>} : vector<8x8xbf16>, vector<8x8xbf16>, vector<8x8xf32> -> vector<8x8xf32>
      %152 = arith.index_cast %129 : i32 to index
      %c0_108 = arith.constant 0 : index
      %153 = vector.load %arg24[%152, %c0_108] : memref<16x32xf32, #tpu.memory_space<vmem>>, vector<8x8xf32>
      tpu.vector_store %arg24[%152, %c0_108], %151 {strides = array<i32>} : memref<16x32xf32, #tpu.memory_space<vmem>>, vector<8x8xf32>,
      %154 = arith.index_cast %129 : i32 to index
      %c8 = arith.constant 8 : index
      %155 = vector.load %arg23[%154, %c8] : memref<16x96xf32, #tpu.memory_space<vmem>>, vector<8x8xf32>
      %156 = arith.index_cast %129 : i32 to index
      %c40 = arith.constant 40 : index
      %157 = vector.load %arg23[%156, %c40] : memref<16x96xf32, #tpu.memory_space<vmem>>, vector<8x8xf32>
      %158 = arith.index_cast %129 : i32 to index
      %c72 = arith.constant 72 : index
      %159 = vector.load %arg23[%158, %c72] : memref<16x96xf32, #tpu.memory_space<vmem>>, vector<8x8xf32>
      %160 = arith.truncf %155 : vector<8x8xf32> to vector<8x8xbf16>
      %161 = arith.truncf %157 : vector<8x8xf32> to vector<8x8xbf16>
      %cst_109 = arith.constant dense<0.000000e+00> : vector<8x8xf32>
      %162 = tpu.matmul %160, %161, %cst_109 {dimension_numbers = #tpu.dot_dimension_numbers<[1], [1], [0], [0], [0, 0, 1, 0], [], []>} : vector<8x8xbf16>, vector<8x8xbf16>, vector<8x8xf32> -> vector<8x8xf32>
      %cst_110 = arith.constant dense<0xFF800000> : vector<8xf32>
      %163 = vector.multi_reduction <maximumf>, %162, %cst_110 [1] : vector<8x8xf32> to vector<8xf32>
      %164 = vector.shape_cast %163 : vector<8xf32> to vector<8x1xf32>
      %165 = vector.broadcast %164 : vector<8x1xf32> to vector<8x8xf32>
      %166 = arith.subf %162, %165 : vector<8x8xf32>
      %167 = math.exp %166 : vector<8x8xf32>
      %cst_111 = arith.constant dense<0.000000e+00> : vector<8xf32>
      %168 = vector.multi_reduction <add>, %167, %cst_111 [1] : vector<8x8xf32> to vector<8xf32>
      %169 = vector.shape_cast %168 : vector<8xf32> to vector<8x1xf32>
      %170 = tpu.reciprocal %169 {approx = true} : vector<8x1xf32> -> vector<8x1xf32>
      %171 = vector.broadcast %170 : vector<8x1xf32> to vector<8x8xf32>
      %172 = arith.mulf %167, %171 : vector<8x8xf32>
      %173 = arith.truncf %172 : vector<8x8xf32> to vector<8x8xbf16>
      %174 = arith.truncf %159 : vector<8x8xf32> to vector<8x8xbf16>
      %cst_112 = arith.constant dense<0.000000e+00> : vector<8x8xf32>
      %175 = tpu.matmul %173, %174, %cst_112 {dimension_numbers = #tpu.dot_dimension_numbers<[1], [0], [0], [1], [0, 0, 1, 1], [], []>} : vector<8x8xbf16>, vector<8x8xbf16>, vector<8x8xf32> -> vector<8x8xf32>
      %176 = arith.index_cast %129 : i32 to index
      %c8_113 = arith.constant 8 : index
      %177 = vector.load %arg24[%176, %c8_113] : memref<16x32xf32, #tpu.memory_space<vmem>>, vector<8x8xf32>
      tpu.vector_store %arg24[%176, %c8_113], %175 {strides = array<i32>} : memref<16x32xf32, #tpu.memory_space<vmem>>, vector<8x8xf32>,
      %178 = arith.index_cast %129 : i32 to index
      %c16 = arith.constant 16 : index
      %179 = vector.load %arg23[%178, %c16] : memref<16x96xf32, #tpu.memory_space<vmem>>, vector<8x8xf32>
      %180 = arith.index_cast %129 : i32 to index
      %c48 = arith.constant 48 : index
      %181 = vector.load %arg23[%180, %c48] : memref<16x96xf32, #tpu.memory_space<vmem>>, vector<8x8xf32>
      %182 = arith.index_cast %129 : i32 to index
      %c80 = arith.constant 80 : index
      %183 = vector.load %arg23[%182, %c80] : memref<16x96xf32, #tpu.memory_space<vmem>>, vector<8x8xf32>
      %184 = arith.truncf %179 : vector<8x8xf32> to vector<8x8xbf16>
      %185 = arith.truncf %181 : vector<8x8xf32> to vector<8x8xbf16>
      %cst_114 = arith.constant dense<0.000000e+00> : vector<8x8xf32>
      %186 = tpu.matmul %184, %185, %cst_114 {dimension_numbers = #tpu.dot_dimension_numbers<[1], [1], [0], [0], [0, 0, 1, 0], [], []>} : vector<8x8xbf16>, vector<8x8xbf16>, vector<8x8xf32> -> vector<8x8xf32>
      %cst_115 = arith.constant dense<0xFF800000> : vector<8xf32>
      %187 = vector.multi_reduction <maximumf>, %186, %cst_115 [1] : vector<8x8xf32> to vector<8xf32>
      %188 = vector.shape_cast %187 : vector<8xf32> to vector<8x1xf32>
      %189 = vector.broadcast %188 : vector<8x1xf32> to vector<8x8xf32>
      %190 = arith.subf %186, %189 : vector<8x8xf32>
      %191 = math.exp %190 : vector<8x8xf32>
      %cst_116 = arith.constant dense<0.000000e+00> : vector<8xf32>
      %192 = vector.multi_reduction <add>, %191, %cst_116 [1] : vector<8x8xf32> to vector<8xf32>
      %193 = vector.shape_cast %192 : vector<8xf32> to vector<8x1xf32>
      %194 = tpu.reciprocal %193 {approx = true} : vector<8x1xf32> -> vector<8x1xf32>
      %195 = vector.broadcast %194 : vector<8x1xf32> to vector<8x8xf32>
      %196 = arith.mulf %191, %195 : vector<8x8xf32>
      %197 = arith.truncf %196 : vector<8x8xf32> to vector<8x8xbf16>
      %198 = arith.truncf %183 : vector<8x8xf32> to vector<8x8xbf16>
      %cst_117 = arith.constant dense<0.000000e+00> : vector<8x8xf32>
      %199 = tpu.matmul %197, %198, %cst_117 {dimension_numbers = #tpu.dot_dimension_numbers<[1], [0], [0], [1], [0, 0, 1, 1], [], []>} : vector<8x8xbf16>, vector<8x8xbf16>, vector<8x8xf32> -> vector<8x8xf32>
      %200 = arith.index_cast %129 : i32 to index
      %c16_118 = arith.constant 16 : index
      %201 = vector.load %arg24[%200, %c16_118] : memref<16x32xf32, #tpu.memory_space<vmem>>, vector<8x8xf32>
      tpu.vector_store %arg24[%200, %c16_118], %199 {strides = array<i32>} : memref<16x32xf32, #tpu.memory_space<vmem>>, vector<8x8xf32>,
      %202 = arith.index_cast %129 : i32 to index
      %c24 = arith.constant 24 : index
      %203 = vector.load %arg23[%202, %c24] : memref<16x96xf32, #tpu.memory_space<vmem>>, vector<8x8xf32>
      %204 = arith.index_cast %129 : i32 to index
      %c56 = arith.constant 56 : index
      %205 = vector.load %arg23[%204, %c56] : memref<16x96xf32, #tpu.memory_space<vmem>>, vector<8x8xf32>
      %206 = arith.index_cast %129 : i32 to index
      %c88 = arith.constant 88 : index
      %207 = vector.load %arg23[%206, %c88] : memref<16x96xf32, #tpu.memory_space<vmem>>, vector<8x8xf32>
      %208 = arith.truncf %203 : vector<8x8xf32> to vector<8x8xbf16>
      %209 = arith.truncf %205 : vector<8x8xf32> to vector<8x8xbf16>
      %cst_119 = arith.constant dense<0.000000e+00> : vector<8x8xf32>
      %210 = tpu.matmul %208, %209, %cst_119 {dimension_numbers = #tpu.dot_dimension_numbers<[1], [1], [0], [0], [0, 0, 1, 0], [], []>} : vector<8x8xbf16>, vector<8x8xbf16>, vector<8x8xf32> -> vector<8x8xf32>
      %cst_120 = arith.constant dense<0xFF800000> : vector<8xf32>
      %211 = vector.multi_reduction <maximumf>, %210, %cst_120 [1] : vector<8x8xf32> to vector<8xf32>
      %212 = vector.shape_cast %211 : vector<8xf32> to vector<8x1xf32>
      %213 = vector.broadcast %212 : vector<8x1xf32> to vector<8x8xf32>
      %214 = arith.subf %210, %213 : vector<8x8xf32>
      %215 = math.exp %214 : vector<8x8xf32>
      %cst_121 = arith.constant dense<0.000000e+00> : vector<8xf32>
      %216 = vector.multi_reduction <add>, %215, %cst_121 [1] : vector<8x8xf32> to vector<8xf32>
      %217 = vector.shape_cast %216 : vector<8xf32> to vector<8x1xf32>
      %218 = tpu.reciprocal %217 {approx = true} : vector<8x1xf32> -> vector<8x1xf32>
      %219 = vector.broadcast %218 : vector<8x1xf32> to vector<8x8xf32>
      %220 = arith.mulf %215, %219 : vector<8x8xf32>
      %221 = arith.truncf %220 : vector<8x8xf32> to vector<8x8xbf16>
      %222 = arith.truncf %207 : vector<8x8xf32> to vector<8x8xbf16>
      %cst_122 = arith.constant dense<0.000000e+00> : vector<8x8xf32>
      %223 = tpu.matmul %221, %222, %cst_122 {dimension_numbers = #tpu.dot_dimension_numbers<[1], [0], [0], [1], [0, 0, 1, 1], [], []>} : vector<8x8xbf16>, vector<8x8xbf16>, vector<8x8xf32> -> vector<8x8xf32>
      %224 = arith.index_cast %129 : i32 to index
      %c24_123 = arith.constant 24 : index
      %225 = vector.load %arg24[%224, %c24_123] : memref<16x32xf32, #tpu.memory_space<vmem>>, vector<8x8xf32>
      tpu.vector_store %arg24[%224, %c24_123], %223 {strides = array<i32>} : memref<16x32xf32, #tpu.memory_space<vmem>>, vector<8x8xf32>,
    }
    %c2_i32_25 = arith.constant 2 : i32
    %c0_26 = arith.constant 0 : index
    %c0_27 = arith.constant 0 : index
    %44 = vector.load %arg24[%c0_26, %c0_27] : memref<16x32xf32, #tpu.memory_space<vmem>>, vector<16x32xf32>
    %45 = arith.truncf %44 : vector<16x32xf32> to vector<16x32xbf16>
    %c0_28 = arith.constant 0 : index
    %c0_29 = arith.constant 0 : index
    %c0_30 = arith.constant 0 : index
    %46 = vector.load %arg6[%c0_28, %c0_29, %c0_30] : memref<1x32x32xbf16, #tpu.memory_space<vmem>>, vector<1x32x32xbf16>
    %47 = vector.shape_cast %46 : vector<1x32x32xbf16> to vector<32x32xbf16>
    %cst_31 = arith.constant dense<0.000000e+00> : vector<16x32xf32>
    %48 = tpu.matmul %45, %47, %cst_31 {dimension_numbers = #tpu.dot_dimension_numbers<[1], [0], [0], [1], [0, 0, 1, 1], [], []>} : vector<16x32xbf16>, vector<32x32xbf16>, vector<16x32xf32> -> vector<16x32xf32>
    %c0_32 = arith.constant 0 : index
    %c0_33 = arith.constant 0 : index
    %c0_34 = arith.constant 0 : index
    %49 = vector.load %arg7[%c0_32, %c0_33, %c0_34] : memref<1x1x32xf32, #tpu.memory_space<vmem>>, vector<1x1x32xf32>
    %50 = vector.shape_cast %49 : vector<1x1x32xf32> to vector<1x32xf32>
    %51 = vector.broadcast %50 : vector<1x32xf32> to vector<16x32xf32>
    %52 = arith.addf %48, %51 : vector<16x32xf32>
    %53 = arith.truncf %52 : vector<16x32xf32> to vector<16x32xbf16>
    %c0_35 = arith.constant 0 : index
    %c0_36 = arith.constant 0 : index
    %c0_37 = arith.constant 0 : index
    %54 = vector.load %arg8[%c0_35, %c0_36, %c0_37] : memref<1x32x96xbf16, #tpu.memory_space<vmem>>, vector<1x32x96xbf16>
    %55 = vector.shape_cast %54 : vector<1x32x96xbf16> to vector<32x96xbf16>
    %cst_38 = arith.constant dense<0.000000e+00> : vector<16x96xf32>
    %56 = tpu.matmul %53, %55, %cst_38 {dimension_numbers = #tpu.dot_dimension_numbers<[1], [0], [0], [1], [0, 0, 1, 1], [], []>} : vector<16x32xbf16>, vector<32x96xbf16>, vector<16x96xf32> -> vector<16x96xf32>
    %c0_39 = arith.constant 0 : index
    %c0_40 = arith.constant 0 : index
    %c0_41 = arith.constant 0 : index
    %57 = vector.load %arg10[%c0_39, %c0_40, %c0_41] : memref<1x1x96xf32, #tpu.memory_space<vmem>>, vector<1x1x96xf32>
    %58 = vector.shape_cast %57 : vector<1x1x96xf32> to vector<1x96xf32>
    %59 = vector.broadcast %58 : vector<1x96xf32> to vector<16x96xf32>
    %60 = arith.addf %56, %59 : vector<16x96xf32>
    %c0_42 = arith.constant 0 : index
    %c0_43 = arith.constant 0 : index
    %61 = vector.load %arg23[%c0_42, %c0_43] : memref<16x96xf32, #tpu.memory_space<vmem>>, vector<16x96xf32>
    tpu.vector_store %arg23[%c0_42, %c0_43], %60 {strides = array<i32>} : memref<16x96xf32, #tpu.memory_space<vmem>>, vector<16x96xf32>,
    %c0_44 = arith.constant 0 : index
    %c0_45 = arith.constant 0 : index
    %c0_46 = arith.constant 0 : index
    %62 = vector.load %arg9[%c0_44, %c0_45, %c0_46] : memref<1x32x96xbf16, #tpu.memory_space<vmem>>, vector<1x32x96xbf16>
    %63 = vector.shape_cast %62 : vector<1x32x96xbf16> to vector<32x96xbf16>
    %c0_47 = arith.constant 0 : index
    %c0_48 = arith.constant 0 : index
    %c0_49 = arith.constant 0 : index
    %64 = vector.load %arg11[%c0_47, %c0_48, %c0_49] : memref<1x1x32xf32, #tpu.memory_space<vmem>>, vector<1x1x32xf32>
    %65 = vector.shape_cast %64 : vector<1x1x32xf32> to vector<1x32xf32>
    %c0_i32_50 = arith.constant 0 : i32
    %c2_i32_51 = arith.constant 2 : i32
    %66 = arith.addi %c0_i32_50, %c2_i32_51 : i32
    %c1_i32_52 = arith.constant 1 : i32
    %67 = scf.for %arg25 = %c0_i32_50 to %66 step %c1_i32_52 iter_args(%arg26 = %9) -> (vector<8x32xf32>)  : i32 {
      %c8_i32_102 = arith.constant 8 : i32
      %128 = arith.muli %arg25, %c8_i32_102 : i32
      %129 = tpu.assume_multiple %128, 8 : i32
      %130 = arith.index_cast %129 : i32 to index
      %c0_103 = arith.constant 0 : index
      %131 = vector.load %arg23[%130, %c0_103] : memref<16x96xf32, #tpu.memory_space<vmem>>, vector<8x96xf32>
      %132 = arith.truncf %arg26 : vector<8x32xf32> to vector<8x32xbf16>
      %cst_104 = arith.constant dense<0.000000e+00> : vector<8x96xf32>
      %133 = tpu.matmul %132, %63, %cst_104 {dimension_numbers = #tpu.dot_dimension_numbers<[1], [0], [0], [1], [0, 0, 1, 1], [], []>} : vector<8x32xbf16>, vector<32x96xbf16>, vector<8x96xf32> -> vector<8x96xf32>
      %134 = vector.extract_strided_slice %131 {offsets = [0, 0], sizes = [8, 32], strides = [1, 1]} : vector<8x96xf32> to vector<8x32xf32>
      %135 = vector.extract_strided_slice %133 {offsets = [0, 0], sizes = [8, 32], strides = [1, 1]} : vector<8x96xf32> to vector<8x32xf32>
      %136 = arith.addf %134, %135 : vector<8x32xf32>
      %137 = arith.negf %136 : vector<8x32xf32>
      %138 = math.exp %137 : vector<8x32xf32>
      %cst_105 = arith.constant 1.000000e+00 : f32
      %139 = vector.broadcast %cst_105 : f32 to vector<8x32xf32>
      %140 = arith.addf %139, %138 : vector<8x32xf32>
      %141 = arith.divf %139, %140 : vector<8x32xf32>
      %142 = vector.extract_strided_slice %131 {offsets = [0, 32], sizes = [8, 32], strides = [1, 1]} : vector<8x96xf32> to vector<8x32xf32>
      %143 = vector.extract_strided_slice %133 {offsets = [0, 32], sizes = [8, 32], strides = [1, 1]} : vector<8x96xf32> to vector<8x32xf32>
      %144 = arith.addf %142, %143 : vector<8x32xf32>
      %145 = arith.negf %144 : vector<8x32xf32>
      %146 = math.exp %145 : vector<8x32xf32>
      %cst_106 = arith.constant 1.000000e+00 : f32
      %147 = vector.broadcast %cst_106 : f32 to vector<8x32xf32>
      %148 = arith.addf %147, %146 : vector<8x32xf32>
      %149 = arith.divf %147, %148 : vector<8x32xf32>
      %150 = vector.extract_strided_slice %131 {offsets = [0, 64], sizes = [8, 32], strides = [1, 1]} : vector<8x96xf32> to vector<8x32xf32>
      %151 = vector.extract_strided_slice %133 {offsets = [0, 64], sizes = [8, 32], strides = [1, 1]} : vector<8x96xf32> to vector<8x32xf32>
      %152 = vector.broadcast %65 : vector<1x32xf32> to vector<8x32xf32>
      %153 = arith.addf %151, %152 : vector<8x32xf32>
      %154 = arith.mulf %141, %153 : vector<8x32xf32>
      %155 = arith.addf %150, %154 : vector<8x32xf32>
      %156 = math.tanh %155 : vector<8x32xf32>
      %cst_107 = arith.constant 1.000000e+00 : f32
      %157 = vector.broadcast %cst_107 : f32 to vector<8x32xf32>
      %158 = arith.subf %157, %149 : vector<8x32xf32>
      %159 = arith.mulf %158, %156 : vector<8x32xf32>
      %160 = arith.mulf %149, %arg26 : vector<8x32xf32>
      %161 = arith.addf %159, %160 : vector<8x32xf32>
      %162 = arith.index_cast %129 : i32 to index
      %c0_108 = arith.constant 0 : index
      %163 = vector.load %arg24[%162, %c0_108] : memref<16x32xf32, #tpu.memory_space<vmem>>, vector<8x32xf32>
      tpu.vector_store %arg24[%162, %c0_108], %161 {strides = array<i32>} : memref<16x32xf32, #tpu.memory_space<vmem>>, vector<8x32xf32>,
      scf.yield %161 : vector<8x32xf32>
    }
    %c2_i32_53 = arith.constant 2 : i32
    %c0_54 = arith.constant 0 : index
    %c0_55 = arith.constant 0 : index
    %68 = vector.load %arg24[%c0_54, %c0_55] : memref<16x32xf32, #tpu.memory_space<vmem>>, vector<16x32xf32>
    %c0_56 = arith.constant 0 : index
    %c0_57 = arith.constant 0 : index
    %c0_58 = arith.constant 0 : index
    %69 = vector.load %arg12[%c0_56, %c0_57, %c0_58] : memref<1x1x32xf32, #tpu.memory_space<vmem>>, vector<1x1x32xf32>
    %70 = vector.shape_cast %69 : vector<1x1x32xf32> to vector<1x32xf32>
    %c0_59 = arith.constant 0 : index
    %c0_60 = arith.constant 0 : index
    %c0_61 = arith.constant 0 : index
    %71 = vector.load %arg13[%c0_59, %c0_60, %c0_61] : memref<1x1x32xf32, #tpu.memory_space<vmem>>, vector<1x1x32xf32>
    %72 = vector.shape_cast %71 : vector<1x1x32xf32> to vector<1x32xf32>
    %cst_62 = arith.constant dense<0.000000e+00> : vector<16xf32>
    %73 = vector.multi_reduction <add>, %68, %cst_62 [1] : vector<16x32xf32> to vector<16xf32>
    %74 = vector.shape_cast %73 : vector<16xf32> to vector<16x1xf32>
    %cst_63 = arith.constant 3.200000e+01 : f32
    %75 = vector.broadcast %cst_63 : f32 to vector<16x1xf32>
    %76 = arith.divf %74, %75 : vector<16x1xf32>
    %77 = vector.broadcast %76 : vector<16x1xf32> to vector<16x32xf32>
    %78 = arith.subf %68, %77 : vector<16x32xf32>
    %79 = arith.mulf %78, %78 : vector<16x32xf32>
    %cst_64 = arith.constant dense<0.000000e+00> : vector<16xf32>
    %80 = vector.multi_reduction <add>, %79, %cst_64 [1] : vector<16x32xf32> to vector<16xf32>
    %81 = vector.shape_cast %80 : vector<16xf32> to vector<16x1xf32>
    %cst_65 = arith.constant 3.200000e+01 : f32
    %82 = vector.broadcast %cst_65 : f32 to vector<16x1xf32>
    %83 = arith.divf %81, %82 : vector<16x1xf32>
    %cst_66 = arith.constant 9.99999974E-6 : f32
    %84 = vector.broadcast %cst_66 : f32 to vector<16x1xf32>
    %85 = arith.addf %83, %84 : vector<16x1xf32>
    %86 = math.rsqrt %85 : vector<16x1xf32>
    %87 = vector.broadcast %86 : vector<16x1xf32> to vector<16x32xf32>
    %88 = arith.mulf %78, %87 : vector<16x32xf32>
    %89 = vector.broadcast %70 : vector<1x32xf32> to vector<16x32xf32>
    %90 = arith.mulf %88, %89 : vector<16x32xf32>
    %91 = vector.broadcast %72 : vector<1x32xf32> to vector<16x32xf32>
    %92 = arith.addf %90, %91 : vector<16x32xf32>
    %93 = arith.truncf %92 : vector<16x32xf32> to vector<16x32xbf16>
    %c0_67 = arith.constant 0 : index
    %c0_68 = arith.constant 0 : index
    %c0_69 = arith.constant 0 : index
    %94 = vector.load %arg14[%c0_67, %c0_68, %c0_69] : memref<1x32x64xbf16, #tpu.memory_space<vmem>>, vector<1x32x64xbf16>
    %95 = vector.shape_cast %94 : vector<1x32x64xbf16> to vector<32x64xbf16>
    %cst_70 = arith.constant dense<0.000000e+00> : vector<16x64xf32>
    %96 = tpu.matmul %93, %95, %cst_70 {dimension_numbers = #tpu.dot_dimension_numbers<[1], [0], [0], [1], [0, 0, 1, 1], [], []>} : vector<16x32xbf16>, vector<32x64xbf16>, vector<16x64xf32> -> vector<16x64xf32>
    %c0_71 = arith.constant 0 : index
    %c0_72 = arith.constant 0 : index
    %c0_73 = arith.constant 0 : index
    %97 = vector.load %arg15[%c0_71, %c0_72, %c0_73] : memref<1x1x64xf32, #tpu.memory_space<vmem>>, vector<1x1x64xf32>
    %98 = vector.shape_cast %97 : vector<1x1x64xf32> to vector<1x64xf32>
    %99 = vector.broadcast %98 : vector<1x64xf32> to vector<16x64xf32>
    %100 = arith.addf %96, %99 : vector<16x64xf32>
    %cst_74 = arith.constant 0.000000e+00 : f32
    %101 = vector.broadcast %cst_74 : f32 to vector<16x64xf32>
    %102 = arith.maximumf %100, %101 : vector<16x64xf32>
    %103 = arith.truncf %102 : vector<16x64xf32> to vector<16x64xbf16>
    %c0_75 = arith.constant 0 : index
    %c0_76 = arith.constant 0 : index
    %c0_77 = arith.constant 0 : index
    %104 = vector.load %arg16[%c0_75, %c0_76, %c0_77] : memref<1x64x32xbf16, #tpu.memory_space<vmem>>, vector<1x64x32xbf16>
    %105 = vector.shape_cast %104 : vector<1x64x32xbf16> to vector<64x32xbf16>
    %cst_78 = arith.constant dense<0.000000e+00> : vector<16x32xf32>
    %106 = tpu.matmul %103, %105, %cst_78 {dimension_numbers = #tpu.dot_dimension_numbers<[1], [0], [0], [1], [0, 0, 1, 1], [], []>} : vector<16x64xbf16>, vector<64x32xbf16>, vector<16x32xf32> -> vector<16x32xf32>
    %c0_79 = arith.constant 0 : index
    %c0_80 = arith.constant 0 : index
    %c0_81 = arith.constant 0 : index
    %107 = vector.load %arg17[%c0_79, %c0_80, %c0_81] : memref<1x1x32xf32, #tpu.memory_space<vmem>>, vector<1x1x32xf32>
    %108 = vector.shape_cast %107 : vector<1x1x32xf32> to vector<1x32xf32>
    %109 = vector.broadcast %108 : vector<1x32xf32> to vector<16x32xf32>
    %110 = arith.addf %106, %109 : vector<16x32xf32>
    %cst_82 = arith.constant 0.000000e+00 : f32
    %111 = vector.broadcast %cst_82 : f32 to vector<16x32xf32>
    %112 = arith.maximumf %110, %111 : vector<16x32xf32>
    %113 = arith.truncf %112 : vector<16x32xf32> to vector<16x32xbf16>
    %c0_83 = arith.constant 0 : index
    %c0_84 = arith.constant 0 : index
    %c0_85 = arith.constant 0 : index
    %114 = vector.load %arg18[%c0_83, %c0_84, %c0_85] : memref<1x32x96xbf16, #tpu.memory_space<vmem>>, vector<1x32x96xbf16>
    %115 = vector.shape_cast %114 : vector<1x32x96xbf16> to vector<32x96xbf16>
    %cst_86 = arith.constant dense<0.000000e+00> : vector<16x96xf32>
    %116 = tpu.matmul %113, %115, %cst_86 {dimension_numbers = #tpu.dot_dimension_numbers<[1], [0], [0], [1], [0, 0, 1, 1], [], []>} : vector<16x32xbf16>, vector<32x96xbf16>, vector<16x96xf32> -> vector<16x96xf32>
    %c0_87 = arith.constant 0 : index
    %c0_88 = arith.constant 0 : index
    %c0_89 = arith.constant 0 : index
    %117 = vector.load %arg20[%c0_87, %c0_88, %c0_89] : memref<1x1x96xf32, #tpu.memory_space<vmem>>, vector<1x1x96xf32>
    %118 = vector.shape_cast %117 : vector<1x1x96xf32> to vector<1x96xf32>
    %119 = vector.broadcast %118 : vector<1x96xf32> to vector<16x96xf32>
    %120 = arith.addf %116, %119 : vector<16x96xf32>
    %c0_90 = arith.constant 0 : index
    %c0_91 = arith.constant 0 : index
    %121 = vector.load %arg23[%c0_90, %c0_91] : memref<16x96xf32, #tpu.memory_space<vmem>>, vector<16x96xf32>
    tpu.vector_store %arg23[%c0_90, %c0_91], %120 {strides = array<i32>} : memref<16x96xf32, #tpu.memory_space<vmem>>, vector<16x96xf32>,
    %c0_92 = arith.constant 0 : index
    %c0_93 = arith.constant 0 : index
    %c0_94 = arith.constant 0 : index
    %122 = vector.load %arg19[%c0_92, %c0_93, %c0_94] : memref<1x32x96xbf16, #tpu.memory_space<vmem>>, vector<1x32x96xbf16>
    %123 = vector.shape_cast %122 : vector<1x32x96xbf16> to vector<32x96xbf16>
    %c0_95 = arith.constant 0 : index
    %c0_96 = arith.constant 0 : index
    %c0_97 = arith.constant 0 : index
    %124 = vector.load %arg21[%c0_95, %c0_96, %c0_97] : memref<1x1x32xf32, #tpu.memory_space<vmem>>, vector<1x1x32xf32>
    %125 = vector.shape_cast %124 : vector<1x1x32xf32> to vector<1x32xf32>
    %c0_i32_98 = arith.constant 0 : i32
    %c2_i32_99 = arith.constant 2 : i32
    %126 = arith.addi %c0_i32_98, %c2_i32_99 : i32
    %c1_i32_100 = arith.constant 1 : i32
    %127 = scf.for %arg25 = %c0_i32_98 to %126 step %c1_i32_100 iter_args(%arg26 = %67) -> (vector<8x32xf32>)  : i32 {
      %c8_i32_102 = arith.constant 8 : i32
      %128 = arith.muli %arg25, %c8_i32_102 : i32
      %129 = tpu.assume_multiple %128, 8 : i32
      %130 = arith.index_cast %129 : i32 to index
      %c0_103 = arith.constant 0 : index
      %131 = vector.load %arg23[%130, %c0_103] : memref<16x96xf32, #tpu.memory_space<vmem>>, vector<8x96xf32>
      %132 = arith.truncf %arg26 : vector<8x32xf32> to vector<8x32xbf16>
      %cst_104 = arith.constant dense<0.000000e+00> : vector<8x96xf32>
      %133 = tpu.matmul %132, %123, %cst_104 {dimension_numbers = #tpu.dot_dimension_numbers<[1], [0], [0], [1], [0, 0, 1, 1], [], []>} : vector<8x32xbf16>, vector<32x96xbf16>, vector<8x96xf32> -> vector<8x96xf32>
      %134 = vector.extract_strided_slice %131 {offsets = [0, 0], sizes = [8, 32], strides = [1, 1]} : vector<8x96xf32> to vector<8x32xf32>
      %135 = vector.extract_strided_slice %133 {offsets = [0, 0], sizes = [8, 32], strides = [1, 1]} : vector<8x96xf32> to vector<8x32xf32>
      %136 = arith.addf %134, %135 : vector<8x32xf32>
      %137 = arith.negf %136 : vector<8x32xf32>
      %138 = math.exp %137 : vector<8x32xf32>
      %cst_105 = arith.constant 1.000000e+00 : f32
      %139 = vector.broadcast %cst_105 : f32 to vector<8x32xf32>
      %140 = arith.addf %139, %138 : vector<8x32xf32>
      %141 = arith.divf %139, %140 : vector<8x32xf32>
      %142 = vector.extract_strided_slice %131 {offsets = [0, 32], sizes = [8, 32], strides = [1, 1]} : vector<8x96xf32> to vector<8x32xf32>
      %143 = vector.extract_strided_slice %133 {offsets = [0, 32], sizes = [8, 32], strides = [1, 1]} : vector<8x96xf32> to vector<8x32xf32>
      %144 = arith.addf %142, %143 : vector<8x32xf32>
      %145 = arith.negf %144 : vector<8x32xf32>
      %146 = math.exp %145 : vector<8x32xf32>
      %cst_106 = arith.constant 1.000000e+00 : f32
      %147 = vector.broadcast %cst_106 : f32 to vector<8x32xf32>
      %148 = arith.addf %147, %146 : vector<8x32xf32>
      %149 = arith.divf %147, %148 : vector<8x32xf32>
      %150 = vector.extract_strided_slice %131 {offsets = [0, 64], sizes = [8, 32], strides = [1, 1]} : vector<8x96xf32> to vector<8x32xf32>
      %151 = vector.extract_strided_slice %133 {offsets = [0, 64], sizes = [8, 32], strides = [1, 1]} : vector<8x96xf32> to vector<8x32xf32>
      %152 = vector.broadcast %125 : vector<1x32xf32> to vector<8x32xf32>
      %153 = arith.addf %151, %152 : vector<8x32xf32>
      %154 = arith.mulf %141, %153 : vector<8x32xf32>
      %155 = arith.addf %150, %154 : vector<8x32xf32>
      %156 = math.tanh %155 : vector<8x32xf32>
      %cst_107 = arith.constant 1.000000e+00 : f32
      %157 = vector.broadcast %cst_107 : f32 to vector<8x32xf32>
      %158 = arith.subf %157, %149 : vector<8x32xf32>
      %159 = arith.mulf %158, %156 : vector<8x32xf32>
      %160 = arith.mulf %149, %arg26 : vector<8x32xf32>
      %161 = arith.addf %159, %160 : vector<8x32xf32>
      %162 = arith.index_cast %129 : i32 to index
      %c0_108 = arith.constant 0 : index
      %163 = vector.load %arg22[%162, %c0_108] : memref<16x32xf32, #tpu.memory_space<vmem>>, vector<8x32xf32>
      tpu.vector_store %arg22[%162, %c0_108], %161 {strides = array<i32>} : memref<16x32xf32, #tpu.memory_space<vmem>>, vector<8x32xf32>,
      scf.yield %161 : vector<8x32xf32>
    }
    %c2_i32_101 = arith.constant 2 : i32
    return
  }
  func.func @transform_0(%arg0: i32) -> (i32, i32) {
    %c0_i32 = arith.constant 0 : i32
    %c0_i32_0 = arith.constant 0 : i32
    %c0_i32_1 = arith.constant 0 : i32
    return %c0_i32, %c0_i32_0 : i32, i32
  }
  func.func @transform_1(%arg0: i32) -> (i32, i32, i32) {
    %c0_i32 = arith.constant 0 : i32
    %c0_i32_0 = arith.constant 0 : i32
    %c0_i32_1 = arith.constant 0 : i32
    return %arg0, %c0_i32, %c0_i32_0 : i32, i32, i32
  }
  func.func @transform_2(%arg0: i32) -> (i32, i32, i32) {
    %c0_i32 = arith.constant 0 : i32
    %c0_i32_0 = arith.constant 0 : i32
    %c0_i32_1 = arith.constant 0 : i32
    return %arg0, %c0_i32, %c0_i32_0 : i32, i32, i32
  }
  func.func @transform_3(%arg0: i32) -> (i32, i32, i32) {
    %c0_i32 = arith.constant 0 : i32
    %c0_i32_0 = arith.constant 0 : i32
    %c0_i32_1 = arith.constant 0 : i32
    return %arg0, %c0_i32, %c0_i32_0 : i32, i32, i32
  }
  func.func @transform_4(%arg0: i32) -> (i32, i32, i32) {
    %c0_i32 = arith.constant 0 : i32
    %c0_i32_0 = arith.constant 0 : i32
    %c0_i32_1 = arith.constant 0 : i32
    return %arg0, %c0_i32, %c0_i32_0 : i32, i32, i32
  }
  func.func @transform_5(%arg0: i32) -> (i32, i32, i32) {
    %c0_i32 = arith.constant 0 : i32
    %c0_i32_0 = arith.constant 0 : i32
    %c0_i32_1 = arith.constant 0 : i32
    return %arg0, %c0_i32, %c0_i32_0 : i32, i32, i32
  }
  func.func @transform_6(%arg0: i32) -> (i32, i32, i32) {
    %c0_i32 = arith.constant 0 : i32
    %c0_i32_0 = arith.constant 0 : i32
    %c0_i32_1 = arith.constant 0 : i32
    return %arg0, %c0_i32, %c0_i32_0 : i32, i32, i32
  }
  func.func @transform_7(%arg0: i32) -> (i32, i32, i32) {
    %c0_i32 = arith.constant 0 : i32
    %c0_i32_0 = arith.constant 0 : i32
    %c0_i32_1 = arith.constant 0 : i32
    return %arg0, %c0_i32, %c0_i32_0 : i32, i32, i32
  }
  func.func @transform_8(%arg0: i32) -> (i32, i32, i32) {
    %c0_i32 = arith.constant 0 : i32
    %c0_i32_0 = arith.constant 0 : i32
    %c0_i32_1 = arith.constant 0 : i32
    return %arg0, %c0_i32, %c0_i32_0 : i32, i32, i32
  }
  func.func @transform_9(%arg0: i32) -> (i32, i32, i32) {
    %c0_i32 = arith.constant 0 : i32
    %c0_i32_0 = arith.constant 0 : i32
    %c0_i32_1 = arith.constant 0 : i32
    return %arg0, %c0_i32, %c0_i32_0 : i32, i32, i32
  }
  func.func @transform_10(%arg0: i32) -> (i32, i32, i32) {
    %c0_i32 = arith.constant 0 : i32
    %c0_i32_0 = arith.constant 0 : i32
    %c0_i32_1 = arith.constant 0 : i32
    return %arg0, %c0_i32, %c0_i32_0 : i32, i32, i32
  }
  func.func @transform_11(%arg0: i32) -> (i32, i32, i32) {
    %c0_i32 = arith.constant 0 : i32
    %c0_i32_0 = arith.constant 0 : i32
    %c0_i32_1 = arith.constant 0 : i32
    return %arg0, %c0_i32, %c0_i32_0 : i32, i32, i32
  }
  func.func @transform_12(%arg0: i32) -> (i32, i32, i32) {
    %c0_i32 = arith.constant 0 : i32
    %c0_i32_0 = arith.constant 0 : i32
    %c0_i32_1 = arith.constant 0 : i32
    return %arg0, %c0_i32, %c0_i32_0 : i32, i32, i32
  }
  func.func @transform_13(%arg0: i32) -> (i32, i32, i32) {
    %c0_i32 = arith.constant 0 : i32
    %c0_i32_0 = arith.constant 0 : i32
    %c0_i32_1 = arith.constant 0 : i32
    return %arg0, %c0_i32, %c0_i32_0 : i32, i32, i32
  }
  func.func @transform_14(%arg0: i32) -> (i32, i32, i32) {
    %c0_i32 = arith.constant 0 : i32
    %c0_i32_0 = arith.constant 0 : i32
    %c0_i32_1 = arith.constant 0 : i32
    return %arg0, %c0_i32, %c0_i32_0 : i32, i32, i32
  }
  func.func @transform_15(%arg0: i32) -> (i32, i32, i32) {
    %c0_i32 = arith.constant 0 : i32
    %c0_i32_0 = arith.constant 0 : i32
    %c0_i32_1 = arith.constant 0 : i32
    return %arg0, %c0_i32, %c0_i32_0 : i32, i32, i32
  }
  func.func @transform_16(%arg0: i32) -> (i32, i32, i32) {
    %c0_i32 = arith.constant 0 : i32
    %c0_i32_0 = arith.constant 0 : i32
    %c0_i32_1 = arith.constant 0 : i32
    return %arg0, %c0_i32, %c0_i32_0 : i32, i32, i32
  }
  func.func @transform_17(%arg0: i32) -> (i32, i32, i32) {
    %c0_i32 = arith.constant 0 : i32
    %c0_i32_0 = arith.constant 0 : i32
    %c0_i32_1 = arith.constant 0 : i32
    return %arg0, %c0_i32, %c0_i32_0 : i32, i32, i32
  }
  func.func @transform_18(%arg0: i32) -> (i32, i32, i32) {
    %c0_i32 = arith.constant 0 : i32
    %c0_i32_0 = arith.constant 0 : i32
    %c0_i32_1 = arith.constant 0 : i32
    return %arg0, %c0_i32, %c0_i32_0 : i32, i32, i32
  }
  func.func @transform_19(%arg0: i32) -> (i32, i32, i32) {
    %c0_i32 = arith.constant 0 : i32
    %c0_i32_0 = arith.constant 0 : i32
    %c0_i32_1 = arith.constant 0 : i32
    return %arg0, %c0_i32, %c0_i32_0 : i32, i32, i32
  }
  func.func @transform_20(%arg0: i32) -> (i32, i32, i32) {
    %c0_i32 = arith.constant 0 : i32
    %c0_i32_0 = arith.constant 0 : i32
    %c0_i32_1 = arith.constant 0 : i32
    return %arg0, %c0_i32, %c0_i32_0 : i32, i32, i32
  }
  func.func @transform_21(%arg0: i32) -> (i32, i32) {
    %c0_i32 = arith.constant 0 : i32
    %c0_i32_0 = arith.constant 0 : i32
    %c0_i32_1 = arith.constant 0 : i32
    return %c0_i32, %c0_i32_0 : i32, i32
  }
}

</mosaic_0001>

<bundles_post_ra>
// kernel: gtrxl_forward.1
= control target key start
LH: loop header
LB: loop body
LE: loop exit
PB: predicated region body
PF: predicated region fallthrough
CT: control target
= control target key end

     0   :  { %s3555_s0 = inlined_call_operand.vmem [shape: f32[16,32], index: 0, kind: input, shape index: {}]   ;;  %s3556_s1 = inlined_call_operand.vmem [shape: f32[2,1,32], index: 1, kind: input, shape index: {}]   ;;  %s3557_s2 = inlined_call_operand.vmem [shape: f32[2,1,32], index: 2, kind: input, shape index: {}]   ;;  %s3558_s3 = inlined_call_operand.vmem [shape: bf16[2,32,96], index: 3, kind: input, shape index: {}]   ;;  %s3559_s4 = inlined_call_operand.hbm [shape: f32[2,1,96], index: 4, kind: input, shape index: {}]   ;;  %s3560_s5 = inlined_call_operand.vmem [shape: bf16[2,32,32], index: 5, kind: input, shape index: {}]   ;;  %s3561_s6 = inlined_call_operand.hbm [shape: f32[2,1,32], index: 6, kind: input, shape index: {}]   ;;  %s3562_s7 = inlined_call_operand.vmem [shape: bf16[2,32,96], index: 7, kind: input, shape index: {}]   ;;  %s3563_s8 = inlined_call_operand.vmem [shape: bf16[2,32,96], index: 8, kind: input, shape index: {}]   ;;  %s3564_s9 = inlined_call_operand.hbm [shape: f32[2,1,96], index: 9, kind: input, shape index: {}]   ;;  %s3565_s10 = inlined_call_operand.hbm [shape: f32[2,1,32], index: 10, kind: input, shape index: {}]   ;;  %s3566_s11 = inlined_call_operand.vmem [shape: f32[2,1,32], index: 11, kind: input, shape index: {}]   ;;  %s3567_s12 = inlined_call_operand.vmem [shape: f32[2,1,32], index: 12, kind: input, shape index: {}]   ;;  %s3568_s13 = inlined_call_operand.vmem [shape: bf16[2,32,64], index: 13, kind: input, shape index: {}]   ;;  %s3569_s14 = inlined_call_operand.vmem [shape: f32[2,1,64], index: 14, kind: input, shape index: {}]   ;;  %s3570_s15 = inlined_call_operand.vmem [shape: bf16[2,64,32], index: 15, kind: input, shape index: {}]   ;;  %s3571_s16 = inlined_call_operand.hbm [shape: f32[2,1,32], index: 16, kind: input, shape index: {}]   ;;  %s3572_s17 = inlined_call_operand.vmem [shape: bf16[2,32,96], index: 17, kind: input, shape index: {}]   ;;  %s3573_s18 = inlined_call_operand.vmem [shape: bf16[2,32,96], index: 18, kind: input, shape index: {}]   ;;  %s3574_s19 = inlined_call_operand.hbm [shape: f32[2,1,96], index: 19, kind: input, shape index: {}]   ;;  %s3575_s20 = inlined_call_operand.hbm [shape: f32[2,1,32], index: 20, kind: input, shape index: {}]   ;;  %s3576_s21 = inlined_call_operand.vmem [shape: f32[16,32], index: 21, kind: output, shape index: {}]  }
   0x1   :  { %3587 = sst [smem:[#allocation22_spill]] %s3555_s0 }
   0x2   :  { %3588 = sst [smem:[#allocation23_spill]] %s3556_s1 }
   0x3   :  { %3589 = sst [smem:[#allocation24_spill]] %s3557_s2 }
   0x4   :  { %3590 = sst [smem:[#allocation25_spill]] %s3558_s3 }
   0x5   :  { %3591 = sst [smem:[#allocation26_spill]] %s3559_s4 }
   0x6   :  { %3592 = sst [smem:[#allocation27_spill]] %s3560_s5 }
   0x7   :  { %3593 = sst [smem:[#allocation28_spill]] %s3561_s6 }
   0x8   :  { %3594 = sst [smem:[#allocation29_spill]] %s3562_s7 }
   0x9   :  { %3595 = sst [smem:[#allocation30_spill]] %s3563_s8 }
   0xa   :  { %3596 = sst [smem:[#allocation31_spill]] %s3564_s9 }
   0xb   :  { %3597 = sst [smem:[#allocation32_spill]] %s3565_s10 }
   0xc   :  { %3598 = sst [smem:[#allocation33_spill]] %s3567_s12 }
   0xd   :  { %3599 = sst [smem:[#allocation34_spill]] %s3568_s13 }
   0xe   :  { %3600 = sst [smem:[#allocation35_spill]] %s3569_s14 }
   0xf   :  { %3601 = sst [smem:[#allocation36_spill]] %s3570_s15 }
  0x10   :  { %3602 = sst [smem:[#allocation37_spill]] %s3571_s16 }
  0x11   :  { %3603 = sst [smem:[#allocation38_spill]] %s3572_s17 }
  0x12   :  { %3604 = sst [smem:[#allocation39_spill]] %s3573_s18 }
  0x13   :  { %3605 = sst [smem:[#allocation40_spill]] %s3574_s19 }
  0x14   :  { %3606 = sst [smem:[#allocation41_spill]] %s3576_s21 }
  0x15   :  { %26 = vsyncpa [#allocation5], 0 }
  0x16   :  { %28 = vsyncpa [#allocation5 + $0x1], 0 }
  0x17   :  { %29 = vsyncpa [#allocation7], 0 }
  0x18   :  { %31 = vsyncpa [#allocation7 + $0x1], 0 }
  0x19   :  { %32 = vsyncpa [#allocation10], 0 }
  0x1a   :  { %34 = vsyncpa [#allocation10 + $0x1], 0 }
  0x1b   :  { %35 = vsyncpa [#allocation13], 0 }
  0x1c   :  { %37 = vsyncpa [#allocation13 + $0x1], 0  ;;  %s3009_s2 = smov 0   ;;  %s3011_s25 = smov 0  }
  0x1d   :  { %s3013_s26 = smov 0   ;;  %s3015_s27 = smov 0  }
  0x1e LB: > { %3607 = sst [smem:[#allocation19_spill]] %s2852_s26  ;;  %s3028_s3 = sadd.s32 4294967295, %s2856_s27   ;;  %s2856_s27 = sphi %s3015_s27, %s3654_s27   ;;  %s2852_s26 = sphi %s3013_s26, %s3656_s26   ;;  %s2848_s25 = sphi %s3011_s25, %s3658_s25   ;;  %s2844_s2 = sphi %s3009_s2, %s3657_s2  }
  0x1f   : > { %s3031_s28 = sadd.s32 1, %s2856_s27   ;;  %s149_s0 = sadd.s32 1, %s2852_s26 }
  0x20   : > { %3608 = sst [smem:[#allocation20_spill]] %s3031_s28  ;;  %s146_s29 = ssub.s32 %s2856_s27, %s3031_s28 }
  0x21   : > { %p147_p0 = scmp.eq.s32.totalorder %s146_s29, 0  ;;  %p156_p1 = scmp.ne.s32.totalorder %s2852_s26, %s2848_s25 }
  0x22   : > { %p157_p2 = scmp.eq.s32.totalorder %s2856_s27, 0  ;;  %p162_p3 = scmp.ne.s32.totalorder %s2848_s25, %s2844_s2 }
  0x23   : > { %s3041_s4 = scalar_select %p147_p0, %s2852_s26, %s149_s0  }
  0x24   : > { %p158_p4 = por %p157_p2, %p156_p1  ;;  %p163_p5 = scmp.eq.s32.totalorder %s3028_s3, 0 }
  0x25   : > { %3609 = sst [smem:[#allocation21_spill]] %s3041_s4  ;;  %p2438_p6 = scmp.lt.s32.totalorder %s2856_s27, 2 }
  0x26   : > { %p3045_p7 = por %p163_p5, %p162_p3  ;;  %s3050_s5 = sand.u32 1, %s2852_s26  }
  0x27   : > { %p3052_p8 = pnand %p2438_p6, %p158_p4  ;;  %s3057_s23 = sand.u32 1, %s2856_s27  }
  0x28   : > { %s3612_s6 = sld [smem:[#allocation28_spill]]  ;;  %s674_s0 = scalar_lea.vmem [#allocation6], %s3050_s5 }
  0x29   : > { %s681_s4 = sshll.u32 %s674_s0, 4  ;;  %s3584_s26 = scalar_lea.sflag [#allocation7], %s3057_s23  ;;  %s682_s4 = int_to_ptr.vmem [resolvable:$true] %s681_s4 }
  0x2a   : > { %p3067_p10 = pneg %p3052_p8 }
  0x2e   : > { %s677_s2 = scalar_lea.hbm %s3612_s6, %s2856_s27 }
  0x2f   : > { %s679_s29 = sshll.u32 %s677_s2, 4  ;;  %s2587_s2 = scalar_lea.hbm %s3612_s6, 2  ;;  %s680_s29 = int_to_ptr.hbm [resolvable:$true] %s679_s29 }
  0x30   : > { %s2580_s28 = sshra.s32 %s680_s29, 4  ;;  %s2581_s28 = int_to_ptr.hbm [resolvable:$true] %s2580_s28 }
  0x31   : > { %s2582_s21 = scalar_lea.hbm %s2581_s28, 1  ;;  %p2588_p13 = scmp.lt.s32.totalorder %s2581_s28, %s3612_s6 }
  0x32   : > { %p2583_p9 = scmp.ne.s32.totalorder %s2581_s28, %s2582_s21  ;;  %p2589_p0 = scmp.lt.s32.totalorder %s2587_s2, %s2582_s21 }
  0x34   : > { %p2585_p11 = pnand %p3067_p10, %p2583_p9  ;;  %p2590_p1 = por %p2589_p0, %p2588_p13 }
  0x36   : > { %p2586_p12 = pneg %p2585_p11 }
  0x38   : > { %p2591_p2 = pnand %p2590_p1, %p2586_p12 }
  0x3a   : > { %2594 = shalt.err (!%p2591_p2)
}
  0x3b   : > { %2422 = dma.hbm_to_vmem [thread:$0]  (!%p3052_p8), %s680_s29, 16, %s682_s4, %s3584_s26  }
  0x3c   : > { %p2262_p3 = scmp.ge.s32.totalorder %s2856_s27, 1  ;;  %p837_p4 = scmp.lt.s32.totalorder %s2856_s27, 3 }
  0x3d   : > { %s3615_s10 = sld [smem:[#allocation32_spill]]  ;;  %s724_s2 = scalar_lea.vmem [#allocation9], %s3050_s5 }
  0x3e   : > { %p3085_p5 = pnand %p2262_p3, %p837_p4  ;;  %s731_s0 = sshll.u32 %s724_s2, 4  ;;  %s732_s0 = int_to_ptr.vmem [resolvable:$true] %s731_s0 }
  0x3f   : > { %s3585_s6 = scalar_lea.sflag [#allocation10], %s3057_s23 }
  0x43   : > { %s727_s1 = scalar_lea.hbm %s3615_s10, %s2856_s27  ;;  %s2617_s26 = scalar_lea.hbm %s3615_s10, 2 }
  0x44   : > { %s729_s24 = sshll.u32 %s727_s1, 4  ;;  %s730_s24 = int_to_ptr.hbm [resolvable:$true] %s729_s24 }
  0x45   : > { %s2610_s15 = sshra.s32 %s730_s24, 4  ;;  %s2611_s15 = int_to_ptr.hbm [resolvable:$true] %s2610_s15 }
  0x46   : > { %s2612_s14 = scalar_lea.hbm %s2611_s15, 1  ;;  %p2618_p12 = scmp.lt.s32.totalorder %s2611_s15, %s3615_s10 }
  0x47   : > { %p2613_p6 = scmp.ne.s32.totalorder %s2611_s15, %s2612_s14  ;;  %p2619_p13 = scmp.lt.s32.totalorder %s2617_s26, %s2612_s14 }
  0x49   : > { %p2615_p9 = pnand %p2613_p6, %p3067_p10  ;;  %p2620_p0 = por %p2619_p13, %p2618_p12 }
  0x4b   : > { %p2616_p11 = pneg %p2615_p9 }
  0x4d   : > { %p2621_p1 = pnand %p2620_p0, %p2616_p11 }
  0x4f   : > { %2624 = shalt.err (!%p2621_p1)
}
  0x50   : > { %2428 = dma.hbm_to_vmem [thread:$0]  (!%p3052_p8), %s730_s24, 16, %s732_s0, %s3585_s6  }
  0x51   : > { %s3616_s19 = sld [smem:[#allocation40_spill]]  ;;  %s808_s4 = scalar_lea.vmem [#allocation12], %s3050_s5 }
  0x52   : > { %s815_s13 = sshll.u32 %s808_s4, 4  ;;  %s806_s14 = scalar_lea.sflag [#allocation13], %s3057_s23  ;;  %s816_s13 = int_to_ptr.vmem [resolvable:$true] %s815_s13 }
  0x57   : > { %s811_s2 = scalar_lea.hbm %s3616_s19, %s2856_s27  ;;  %s2647_s24 = scalar_lea.hbm %s3616_s19, 2 }
  0x58   : > { %s813_s15 = sshll.u32 %s811_s2, 4  ;;  %s814_s15 = int_to_ptr.hbm [resolvable:$true] %s813_s15 }
  0x59   : > { %s2640_s26 = sshra.s32 %s814_s15, 4  ;;  %s2641_s26 = int_to_ptr.hbm [resolvable:$true] %s2640_s26 }
  0x5a   : > { %s2642_s29 = scalar_lea.hbm %s2641_s26, 1  ;;  %p2648_p6 = scmp.lt.s32.totalorder %s2641_s26, %s3616_s19 }
  0x5b   : > { %p2643_p2 = scmp.ne.s32.totalorder %s2641_s26, %s2642_s29  ;;  %p2649_p9 = scmp.lt.s32.totalorder %s2647_s24, %s2642_s29 }
  0x5d   : > { %p2645_p3 = pnand %p2643_p2, %p3067_p10  ;;  %p2650_p11 = por %p2649_p9, %p2648_p6 }
  0x5f   : > { %p2646_p4 = pneg %p2645_p3 }
  0x61   : > { %p2651_p12 = pnand %p2650_p11, %p2646_p4 }
  0x63   : > { %2654 = shalt.err (!%p2651_p12)
}
  0x64   : > { %2434 = dma.hbm_to_vmem [thread:$0]  (!%p3052_p8), %s814_s15, 16, %s816_s13, %s806_s14  }
  0x65   : > { %s3617_s2 = sld [smem:[#allocation26_spill]]  ;;  %s649_s0 = scalar_lea.vmem [#allocation4], %s3050_s5 }
  0x66   : > { %s656_s26 = sshll.u32 %s649_s0, 4  ;;  %s647_s29 = scalar_lea.sflag [#allocation5], %s3050_s5  ;;  %s657_s26 = int_to_ptr.vmem [resolvable:$true] %s656_s26 }
  0x6b   : > { %s3618_s4 = smov %s3617_s2  ;;  %s652_s21 = scalar_lea.hbm %s3617_s2, %s2856_s27 }
  0x6c   : > { %s654_s6 = sshll.u32 %s652_s21, 4  ;;  %s2677_s13 = scalar_lea.hbm %s3618_s4, 2  ;;  %s655_s6 = int_to_ptr.hbm [resolvable:$true] %s654_s6 }
  0x6d   : > { %s2670_s24 = sshra.s32 %s655_s6, 4  ;;  %s2671_s24 = int_to_ptr.hbm [resolvable:$true] %s2670_s24 }
  0x6e   : > { %s2672_s28 = scalar_lea.hbm %s2671_s24, 1  ;;  %p2678_p2 = scmp.lt.s32.totalorder %s2671_s24, %s3618_s4 }
  0x6f   : > { %p2673_p13 = scmp.ne.s32.totalorder %s2671_s24, %s2672_s28  ;;  %p2679_p3 = scmp.lt.s32.totalorder %s2677_s13, %s2672_s28 }
  0x71   : > { %p2675_p0 = pnand %p2673_p13, %p3067_p10  ;;  %p2680_p4 = por %p2679_p3, %p2678_p2 }
  0x73   : > { %p2676_p1 = pneg %p2675_p0 }
  0x75   : > { %p2681_p6 = pnand %p2680_p4, %p2676_p1 }
  0x77   : > { %2684 = shalt.err (!%p2681_p6)
}
  0x78   : > { %2419 = dma.hbm_to_vmem [thread:$0]  (!%p3052_p8), %s655_s6, 16, %s657_s26, %s647_s29  }
  0x79   : > { %s3619_s9 = sld [smem:[#allocation31_spill]]  ;;  %s707_s19 = scalar_lea.vmem [#allocation8], %s3050_s5 }
  0x7a   : > { %s714_s0 = sshll.u32 %s707_s19, 4  ;;  %s715_s0 = int_to_ptr.vmem [resolvable:$true] %s714_s0 }
  0x7f   : > { %s710_s21 = scalar_lea.hbm %s3619_s9, %s2856_s27  ;;  %s2707_s6 = scalar_lea.hbm %s3619_s9, 2 }
  0x80   : > { %s712_s12 = sshll.u32 %s710_s21, 4  ;;  %s713_s12 = int_to_ptr.hbm [resolvable:$true] %s712_s12 }
  0x81   : > { %s2700_s24 = sshra.s32 %s713_s12, 4  ;;  %s2701_s24 = int_to_ptr.hbm [resolvable:$true] %s2700_s24 }
  0x82   : > { %s2702_s28 = scalar_lea.hbm %s2701_s24, 1  ;;  %p2708_p13 = scmp.lt.s32.totalorder %s2701_s24, %s3619_s9 }
  0x83   : > { %p2703_p9 = scmp.ne.s32.totalorder %s2701_s24, %s2702_s28  ;;  %p2709_p0 = scmp.lt.s32.totalorder %s2707_s6, %s2702_s28 }
  0x85   : > { %p2705_p11 = pnand %p2703_p9, %p3067_p10  ;;  %p2710_p1 = por %p2709_p0, %p2708_p13 }
  0x87   : > { %p2706_p12 = pneg %p2705_p11 }
  0x89   : > { %p2711_p2 = pnand %p2710_p1, %p2706_p12 }
  0x8b   : > { %2714 = shalt.err (!%p2711_p2)
}
  0x8c   : > { %s3620_s1 = scalar_lea.sflag [#allocation7], %s3057_s23  ;;  %s3621_s16 = sld [smem:[#allocation37_spill]] }
  0x8d   : > { %2425 = dma.hbm_to_vmem [thread:$0]  (!%p3052_p8), %s713_s12, 16, %s715_s0, %s3620_s1  }
  0x8e   : > { %s775_s13 = scalar_lea.vmem [#allocation11], %s3050_s5 }
  0x8f   : > { %s782_s15 = sshll.u32 %s775_s13, 4  ;;  %s783_s15 = int_to_ptr.vmem [resolvable:$true] %s782_s15 }
  0x92   : > { %s778_s21 = scalar_lea.hbm %s3621_s16, %s2856_s27  ;;  %s2737_s12 = scalar_lea.hbm %s3621_s16, 2 }
  0x93   : > { %s780_s19 = sshll.u32 %s778_s21, 4  ;;  %s781_s19 = int_to_ptr.hbm [resolvable:$true] %s780_s19 }
  0x94   : > { %s2730_s24 = sshra.s32 %s781_s19, 4  ;;  %s2731_s24 = int_to_ptr.hbm [resolvable:$true] %s2730_s24 }
  0x95   : > { %s2732_s28 = scalar_lea.hbm %s2731_s24, 1  ;;  %p2738_p9 = scmp.lt.s32.totalorder %s2731_s24, %s3621_s16 }
  0x96   : > { %p2733_p3 = scmp.ne.s32.totalorder %s2731_s24, %s2732_s28  ;;  %p2739_p11 = scmp.lt.s32.totalorder %s2737_s12, %s2732_s28 }
  0x98   : > { %p2735_p4 = pnand %p2733_p3, %p3067_p10  ;;  %p2740_p12 = por %p2739_p11, %p2738_p9 }
  0x9a   : > { %p2736_p6 = pneg %p2735_p4 }
  0x9c   : > { %p2741_p13 = pnand %p2740_p12, %p2736_p6 }
  0x9e   : > { %2744 = shalt.err (!%p2741_p13)
}
  0x9f   : > { %s3622_s1 = scalar_lea.sflag [#allocation10], %s3057_s23  ;;  %s828_s21 = scalar_lea.hbm %s3575_s20, %s2856_s27 }
  0xa0   : > { %2431 = dma.hbm_to_vmem [thread:$0]  (!%p3052_p8), %s781_s19, 16, %s783_s15, %s3622_s1  }
  0xa1   : > { %s830_s13 = sshll.u32 %s828_s21, 4  ;;  %s825_s6 = scalar_lea.vmem [#allocation14], %s3050_s5  ;;  %s831_s13 = int_to_ptr.hbm [resolvable:$true] %s830_s13 }
  0xa2   : > { %s832_s26 = sshll.u32 %s825_s6, 4  ;;  %s2760_s24 = sshra.s32 %s831_s13, 4  ;;  %s833_s26 = int_to_ptr.vmem [resolvable:$true] %s832_s26  ;;  %s2761_s24 = int_to_ptr.hbm [resolvable:$true] %s2760_s24 }
  0xa3   : > { %s2762_s28 = scalar_lea.hbm %s2761_s24, 1  ;;  %s2767_s19 = scalar_lea.hbm %s3575_s20, 2 }
  0xa4   : > { %p2763_p0 = scmp.ne.s32.totalorder %s2761_s24, %s2762_s28  ;;  %p2768_p3 = scmp.lt.s32.totalorder %s2761_s24, %s3575_s20 }
  0xa5   : > { %p2769_p4 = scmp.lt.s32.totalorder %s2767_s19, %s2762_s28 }
  0xa6   : > { %p2765_p1 = pnand %p2763_p0, %p3067_p10 }
  0xa7   : > { %p2770_p6 = por %p2769_p4, %p2768_p3 }
  0xa8   : > { %p2766_p2 = pneg %p2765_p1 }
  0xaa   : > { %p2771_p9 = pnand %p2770_p6, %p2766_p2 }
  0xac   : > { %2774 = shalt.err (!%p2771_p9)
}
  0xad   : > { %2437 = dma.hbm_to_vmem [thread:$0]  (!%p3052_p8), %s831_s13, 16, %s833_s26, %s806_s14  }
  0xae   : > { %841 = sbr.rel (%p3085_p5) target bundleno = 3981 (0xf8d), region = 104  ;;  %s3195_s18 = sand.u32 (!%p3085_p5), 1, %s2848_s25  }
  0xaf   : > { %s844_s27 = scalar_lea.sflag (!%p3085_p5), [#allocation5], %s3195_s18 }
  0xb3   : > { %2827 = dma.done.wait (%p3045_p7), %s844_s27, 16  }
  0xb4   : > { %2829 = vsyncadd (%p3045_p7), %s844_s27, 4294967280  ;;  %s852_s22 = sand.u32 1, %s3028_s3  }
  0xb5   : > { %s853_s23 = scalar_lea.sflag [#allocation7], %s852_s22 }
  0xb6   : > { %2831 = dma.done.wait (%p3045_p7), %s853_s23, 32  }
  0xb7   : > { %2833 = vsyncadd (%p3045_p7), %s853_s23, 4294967264  ;;  %s871_s1 = scalar_lea.sflag [#allocation10], %s852_s22 }
  0xb8   : > { %2835 = dma.done.wait (%p3045_p7), %s871_s1, 32  }
  0xb9   : > { %2837 = vsyncadd (%p3045_p7), %s871_s1, 4294967264  ;;  %s889_s21 = scalar_lea.sflag [#allocation13], %s852_s22 }
  0xba   : > { %2839 = dma.done.wait (%p3045_p7), %s889_s21, 32  }
  0xbb   : > { %2841 = vsyncadd (%p3045_p7), %s889_s21, 4294967264  ;;  %p1033_p8 = scmp.lt.s32.totalorder %s3028_s3, 1  ;;  %s3625_s26 = sld [smem:[#allocation25_spill]] }
  0xbc   : > { %s3626_s14 = sld [smem:[#allocation27_spill]]  ;;  %p2279_p7 = scmp.ne.s32.totalorder %s3028_s3, 0 }
  0xbd   : > { %s3223_s6 = scalar_select %p1033_p8, %s3028_s3, 1 }
  0xbe   : > { %s3627_s7 = sld [smem:[#allocation29_spill]] }
  0xbf   : > { %s2376_s29 = sshll.u32 %s3223_s6, 4  ;;  %s3628_s8 = sld [smem:[#allocation30_spill]] }
  0xc0   : > { %s3629_s1 = sld [smem:[#allocation33_spill]]  ;;  %s2381_s28 = sshll.u32 %s3223_s6, 5 }
  0xc1   : > { %s3241_s24 = scalar_lea.vmem %s3625_s26, %s2376_s29  ;;  %s3630_s15 = sld [smem:[#allocation34_spill]] }
  0xc2   : > { %s3246_s10 = scalar_lea.vmem %s3626_s14, %s2376_s29  ;;  %s3631_s12 = sld [smem:[#allocation35_spill]] }
  0xc3   : > { %s3632_s9 = sld [smem:[#allocation36_spill]]  ;;  %s900_s26 = scalar_lea.vmem [#allocation14], %s3195_s18 }
  0xc4   : > { %s3251_s0 = scalar_lea.vmem %s3627_s7, %s2376_s29  ;;  %s3633_s16 = sld [smem:[#allocation38_spill]] }
  0xc5   : > { %s3256_s27 = scalar_lea.vmem %s3628_s8, %s2376_s29  ;;  %s3634_s5 = sld [smem:[#allocation39_spill]] }
  0xc6   : > { %s1064_s21 = scalar_lea.vmem %s3629_s1, %s3223_s6  ;;  %s3635_s13 = sld [smem:[#allocation22_spill]] (!%p2279_p7) }
  0xc7   : > { %s3265_s2 = scalar_lea.vmem %s3630_s15, %s2376_s29  ;;  %1092 = sbr.rel (%p2279_p7) target bundleno = 208 (0xd0), region = 136 }
  0xc8   : > { %s1072_s17 = scalar_lea.vmem %s3631_s12, %s3223_s6  ;;  %s3636_s4 = sld [smem:[#allocation41_spill]] (!%p2279_p7) }
  0xc9   : > { %s3275_s30 = scalar_lea.vmem %s3632_s9, %s2381_s28 }
  0xca   : > { %s3280_s23 = scalar_lea.vmem %s3633_s16, %s2376_s29 }
  0xcb   : > { %s3285_s15 = scalar_lea.vmem %s3634_s5, %s2376_s29 }
  0xcc   : > { %v1093_v0 = vld [vmem:[%s3635_s13] sm:$0xff]  ;;  %vm1095_vm0 = vcmask 261120   ;;  %v1094_v1 = vld [vmem:[%s3635_s13 + $0x8] sm:$0xff] }
  0xce   : > { %1096 = vst.msk [vmem:[%s3636_s4] sm:$0xff] %vm1095_vm0, %v1093_v0 }
  0xcf   : > { %1097 = vst.msk [vmem:[%s3636_s4 + $0x8] sm:$0xff] %vm1095_vm0, %v1094_v1 }
  0xd0 PF: > { %s3637_s22 = sld [smem:[#allocation41_spill]]  ;;  %vm1105_vm1 = vcmask 261120   ;;  %v2878_v7 = vmov 32.0   ;;  %v2385_v24 = vld [vmem:[%s3241_s24 + $0x8] sm:$0xff]  ;;  %v2384_v26 = vld [vmem:[%s3241_s24] sm:$0xff]  ;;  %s3642_s28 = scalar_lea.vmem [#allocation4], %s3195_s18 }
  0xd1   : > { %2535 = vrcp.f32 %v2878_v7  ;;  %1197 = vmatpush.bf16.msra.mxu0 %v2385_v24  ;;  %s3638_s14 = sld [smem:[#allocation23_spill]]  ;;  %v2534_v55 = vld [vmem:[%s3642_s28] ss:$0 sm:$0xff]  ;;  %vm1205_vm9 = vcmask 785408   ;;  %s3336_s29 = smov 0  }
  0xd2   : > { %s3640_s16 = sld [smem:[#allocation24_spill]] }
  0xd5   : > { %1198 = vmatpush.bf16.msra.mxu0 %v2384_v26 }
  0xd6   : > { %v1098_v2 = vld [vmem:[%s3637_s22] sm:$0xff]  ;;  %v2280_v3 = vld [vmem:[%s3637_s22 + $0x8] sm:$0xff] }
  0xd7   : > { %v1106_v4 = vsel %vm1105_vm1, %v1098_v2, 0.0  ;;  %v3308_v5 = vadd.f32 %v2280_v3, %v1098_v2   ;;  %v1109_v6 = vsel %vm1105_vm1, %v2280_v3, 0.0  ;;  %v2536_v8 = vpop.eup %2535  ;;  %s3639_s7 = scalar_lea.vmem %s3638_s14, %s3223_s6 }
  0xd8   : > { %1107 = vadd.xlane.f32.xlu0 %v1106_v4  ;;  %v1113_v9 = vmul.f32 32.0, %v2536_v8  ;;  %vm1117_vm2 = vweird.f32 %v2536_v8  ;;  %v2532_v45 = vld [vmem:[%s3639_s7] ss:$0 sm:$0xff]  ;;  %s3641_s4 = scalar_lea.vmem %s3640_s16, %s3223_s6 }
  0xd9   : > { %v2533_v50 = vld [vmem:[%s3641_s4] ss:$0 sm:$0xff] }
  0xda   : > { %v1114_v10 = vsub.f32 1.0, %v1113_v9 }
  0xdc   : > { %v1115_v11 = vmul.f32 %v2536_v8, %v1114_v10 }
  0xde   : > { %v1116_v12 = vadd.f32 %v2536_v8, %v1115_v11 }
  0xe0   : > { %1110 = vadd.xlane.f32.xlu0 %v1109_v6  ;;  %v3311_v13 = vsel %vm1117_vm2, %v2536_v8, %v1116_v12 }
 0x14b   : > { %v1108_v14 = vpop.xlane.xlu0 %1107 }
 0x14c   : > { %v1119_v15 = vmul.f32 %v3311_v13, %v1108_v14 }
 0x14e   : > { %v1121_v16 = vsub.f32 %v1098_v2, %v1119_v15 }
 0x150   : > { %v1123_v17 = vmul.f32 %v1121_v16, %v1121_v16 }
 0x152   : > { %v1125_v18 = vsel %vm1105_vm1, %v1123_v17, 0.0 }
 0x153   : > { %1126 = vadd.xlane.f32.xlu1 %v1125_v18  ;;  %v1111_v19 = vpop.xlane.xlu0 %1110 }
 0x154   : > { %v1120_v20 = vmul.f32 %v3311_v13, %v1111_v19 }
 0x156   : > { %v1122_v21 = vsub.f32 %v2280_v3, %v1120_v20 }
 0x158   : > { %v1124_v22 = vmul.f32 %v1122_v21, %v1122_v21 }
 0x15a   : > { %v1128_v23 = vsel %vm1105_vm1, %v1124_v22, 0.0 }
 0x15b   : > { %1129 = vadd.xlane.f32.xlu1 %v1128_v23 }
 0x1c6   : > { %v1127_v25 = vpop.xlane.xlu1 %1126 }
 0x1c7   : > { %v1131_v27 = vmul.f32 %v1127_v25, %v3311_v13 }
 0x1c9   : > { %v1133_v28 = vadd.f32 1e-05, %v1131_v27 }
 0x1cb   : > { %2537 = vrsqrt.f32 %v1133_v28  ;;  %vm1141_vm4 = vweird.f32 %v1133_v28 }
 0x1ce   : > { %v1130_v29 = vpop.xlane.xlu1 %1129 }
 0x1cf   : > { %v1132_v30 = vmul.f32 %v1130_v29, %v3311_v13 }
 0x1d1   : > { %v2538_v31 = vpop.eup %2537  ;;  %v1134_v32 = vadd.f32 1e-05, %v1132_v30 }
 0x1d2   : > { %v1136_v33 = vmul.f32 %v2538_v31, %v1133_v28  ;;  %vm1142_vm3 = vweird.f32 %v2538_v31 }
 0x1d3   : > { %2539 = vrsqrt.f32 %v1134_v32  ;;  %vm1143_vm5 = vmor %vm1141_vm4, %vm1142_vm3  ;;  %vm1151_vm7 = vweird.f32 %v1134_v32 }
 0x1d4   : > { %v1137_v34 = vmul.f32 %v2538_v31, %v1136_v33 }
 0x1d6   : > { %v1138_v35 = vmul.f32 0.5, %v1137_v34 }
 0x1d8   : > { %v1139_v36 = vsub.f32 1.5, %v1138_v35 }
 0x1d9   : > { %v2540_v37 = vpop.eup %2539 }
 0x1da   : > { %v1140_v38 = vmul.f32 %v2538_v31, %v1139_v36  ;;  %v1146_v39 = vmul.f32 %v2540_v37, %v1134_v32  ;;  %vm1152_vm6 = vweird.f32 %v2540_v37 }
 0x1db   : > { %vm1153_vm8 = vmor %vm1151_vm7, %vm1152_vm6 }
 0x1dc   : > { %v1147_v40 = vmul.f32 %v2540_v37, %v1146_v39  ;;  %v1144_v41 = vsel %vm1143_vm5, %v2538_v31, %v1140_v38 }
 0x1dd   : > { %v1155_v44 = vmul.f32 %v1144_v41, %v1121_v16 }
 0x1de   : > { %v1148_v42 = vmul.f32 0.5, %v1147_v40 }
 0x1df   : > { %v1160_v49 = vmul.f32 %v2532_v45, %v1155_v44 }
 0x1e0   : > { %v1149_v43 = vsub.f32 1.5, %v1148_v42 }
 0x1e1   : > { %v1165_v52 = vadd.f32 %v2533_v50, %v1160_v49 }
 0x1e2   : > { %v1150_v46 = vmul.f32 %v2540_v37, %v1149_v43 }
 0x1e4   : > { %v1154_v47 = vsel %vm1153_vm8, %v2540_v37, %v1150_v46 }
 0x1e5   : > { %v1156_v48 = vmul.f32 %v1154_v47, %v1122_v21 }
 0x1e7   : > { %v1161_v51 = vmul.f32 %v2532_v45, %v1156_v48 }
 0x1e9   : > { %v1166_v53 = vadd.f32 %v2533_v50, %v1161_v51 }
 0x1eb   : > { %v1167_v54 = vpack.c.bf16 %v1166_v53, %v1165_v52 }
 0x1ed   : > { %2289 = vmatmul.msk.bf16.vlgmr.msra.gmra.mxu0 %vm1105_vm1, %v1167_v54 }
 0x26a   : > { %v1200_v56 = vpop.f32.mrf.mxu0 }
 0x26b   : > { %v1201_v57 = vadd.f32 %v2534_v55, %v1200_v56 }
 0x26d   : > { %1206 = vst.msk [vmem:[#allocation2] sm:$0xff] %vm1205_vm9, %v1201_v57 }
 0x272   : > { %v1202_v58 = vpop.f32.mrf.mxu0 }
 0x273   : > { %v1203_v59 = vadd.f32 %v2534_v55, %v1202_v58 }
 0x275   : > { %1207 = vst.msk [vmem:[#allocation2 + $0x8] sm:$0xff] %vm1205_vm9, %v1203_v59 }
 0x276 LB: >> { %s2290_s3 = sshll.u32 %s2860_s29, 3  ;;  %s2879_s22 = smov 96   ;;  %vm1221_vm10 = vcmask 64512   ;;  %vm1258_vm11 = vcmask 1043456   ;;  %vm1340_vm12 = vcmask 130112   ;;  %vm1405_vm13 = vcmask 195712   ;;  %s2860_s29 = sphi %s3336_s29, %s1213_s29  }
 0x277   : >> { %s1215_s19 = scalar_lea.vmem [#allocation2], %s2290_s3  ;;  %s2880_s1 = smov 88   ;;  %vm1470_vm14 = vcmask 261312  }
 0x278   : >> { %s2881_s5 = smov 120   ;;  %s2882_s24 = smov 64  }
 0x279   : >> { %s2883_s12 = smov 80   ;;  %s2884_s14 = smov 72  }
 0x27a   : >> { %s2885_s7 = smov 112   ;;  %s2886_s9 = smov 104  }
 0x27b   : >> { %s2887_s8 = smov 56   ;;  %s2888_s16 = smov 40  }
 0x27c   : >> { %v1216_v60 = vld [vmem:[%s1215_s19] sm:$0xff]  ;;  %s3373_s4 = scalar_lea.vmem [#allocation3], %s2290_s3  ;;  %s2889_s28 = smov 48  }
 0x27d   : >> { %v3344_v61 = vpack.c.bf16 %v1216_v60, %v1216_v60  ;;  %s2890_s3 = smov 8   ;;  %s2891_s19 = smov 16  }
 0x27e   : >> { %s1213_s29 = sadd.s32 1, %s2860_s29  }
 0x27f   : >> { %1219 = vrot.lane.b32.xlu0 %v3344_v61, %s2879_s22  ;;  %1282 = vrot.lane.b32.xlu1 %v3344_v61, %s2880_s1  ;;  %s2892_s22 = smov 24   ;;  %p1210_p10 = scmp.ge.s32.totalorder %s1213_s29, 2  }
 0x280   : >> { %1280 = vrot.lane.b32.xlu2 %v3344_v61, %s2881_s5  ;;  %s3643_s29 = scalar_lea.vmem (%p1210_p10), [#allocation6], %s3195_s18  ;;  %s3425_s1 = smov (%p1210_p10), 0  }
 0x288   : >> { %1253 = vrot.lane.b32.xlu2 %v3344_v61, %s2882_s24 }
 0x290   : >> { %1347 = vrot.lane.b32.xlu2 %v3344_v61, %s2883_s12 }
 0x298   : >> { %1412 = vrot.lane.b32.xlu2 %v3344_v61, %s2884_s14 }
 0x2a0   : >> { %1345 = vrot.lane.b32.xlu2 %v3344_v61, %s2885_s7 }
 0x2a8   : >> { %1410 = vrot.lane.b32.xlu2 %v3344_v61, %s2886_s9 }
 0x2da   : >> { %v1281_v2 = vpop.permute.xlu2 %1280 }
 0x2e2   : >> { %v1254_v7 = vpop.permute.xlu2 %1253 }
 0x2e3   : >> { %v1260_v12 = vsel %vm1258_vm11, %v1254_v7, 0 }
 0x2e4   : >> { %1269 = vmatpush.bf16.msra.mxu1 %v1260_v12 }
 0x2ea   : >> { %v1348_v8 = vpop.permute.xlu2 %1347 }
 0x2eb   : >> { %v1353_v10 = vsel %vm1221_vm10, %v1348_v8, 0 }
 0x2ec   : >> { %1362 = vmatpush.bf16.xpose.msrb.mxu1 %v1353_v10 }
 0x2f1   : >> { %v1220_v62 = vpop.permute.xlu0 %1219  ;;  %v1283_v0 = vpop.permute.xlu1 %1282 }
 0x2f2   : >> { %v1226_v63 = vsel %vm1221_vm10, %v1220_v62, 0  ;;  %v1288_v1 = vsel %vm1221_vm10, %v1283_v0, 0  ;;  %v1413_v9 = vpop.permute.xlu2 %1412 }
 0x2f3   : >> { %1235 = vmatpush.bf16.xpose.msra.mxu0 %v1226_v63  ;;  %1297 = vmatpush.bf16.xpose.msra.mxu2 %v1288_v1  ;;  %v1418_v11 = vsel %vm1221_vm10, %v1413_v9, 0 }
 0x2fa   : >> { %2291 = vmatmul.msk.bf16.vlgmr.msra.gmra.mxu0 %vm1221_vm10, %v3344_v61  ;;  %2293 = vmatmul.msk.bf16.vlgmr.msra.gmra.mxu2 %vm1221_vm10, %v1281_v2  ;;  %v1346_v14 = vpop.permute.xlu2 %1345 }
 0x2fb   : >> { %1427 = vmatpush.bf16.xpose.msrb.mxu0 %v1418_v11 }
 0x302   : >> { %v1411_v15 = vpop.permute.xlu2 %1410 }
 0x30a   : >> { %2297 = vmatmul.msk.bf16.vlgmr.msrb.gmra.mxu0 %vm1221_vm10, %v1411_v15 }
 0x377   : >> { %v1237_v3 = vpop.f32.mrf.mxu0 }
 0x378   : >> { %v1241_v4 = vsel %vm1221_vm10, %v1237_v3, -inf }
 0x379   : >> { %1242 = vmax.xlane.f32.xlu0 %v1241_v4 }
 0x37d   : >> { %v1299_v16 = vpop.f32.mrf.mxu2 }
 0x37e   : >> { %v1303_v18 = vsel %vm1221_vm10, %v1299_v16, -inf }
 0x37f   : >> { %v1239_v6 = vpop.f32.mrf.mxu0  ;;  %1304 = vmax.xlane.f32.xlu2 %v1303_v18 }
 0x385   : >> { %v1301_v21 = vpop.f32.mrf.mxu2 }
 0x386   : > { %v2389_v21 = vld [vmem:[%s3251_s0 + $0x8] sm:$0xff] (%p1210_p10) }
 0x387   : >> { %v1429_v24 = vpop.f32.mrf.mxu0 }
 0x388   : >> { %v1433_v25 = vsel %vm1221_vm10, %v1429_v24, -inf }
 0x38f   : >> { %v1431_v27 = vpop.f32.mrf.mxu0 }
 0x3ec   : >> { %v1243_v17 = vpop.xlane.xlu0 %1242 }
 0x3ed   : >> { %v1244_v19 = vsub.f32 %v1237_v3, %v1243_v17  ;;  %v2386_v17 = vld [vmem:[%s3246_s10] sm:$0xff] (%p1210_p10) }
 0x3ef   : >> { %v1245_v20 = vmul.f32 1.442695, %v1244_v19 }
 0x3f1   : >> { %2541 = vpow2.f32 %v1245_v20 }
 0x3f2   : >> { %v1305_v32 = vpop.xlane.xlu2 %1304 }
 0x3f3   : >> { %v1306_v33 = vsub.f32 %v1299_v16, %v1305_v32  ;;  %v2387_v16 = vld [vmem:[%s3246_s10 + $0x8] sm:$0xff] (%p1210_p10)  ;;  %s3644_s10 = scalar_lea.vmem (%p1210_p10), [#allocation9], %s3195_s18 }
 0x3f4   : > { %1504 = vmatpush.bf16.msra.mxu0 (%p1210_p10), %v2387_v16  ;;  %v3412_v32 = vld [vmem:[%s3256_s27 + $0x8] sm:$0xf0] (%p1210_p10) }
 0x3f5   : >> { %v1307_v35 = vmul.f32 1.442695, %v1306_v33  ;;  %v3416_v33 = vld [vmem:[%s3644_s10] sm:$0x1] (%p1210_p10) }
 0x3f7   : >> { %v2542_v22 = vpop.eup %2541 }
 0x3f8   : >> { %v1247_v23 = vsel %vm1221_vm10, %v2542_v22, 0.0  ;;  %1505 = vmatpush.bf16.msra.mxu0 (%p1210_p10), %v2386_v17 }
 0x3f9   : >> { %1248 = vadd.xlane.f32.xlu1 %v1247_v23 }
 0x401   : >> { %1434 = vmax.xlane.f32.xlu1 %v1433_v25 }
 0x41a   : >> { %1315 = vrot.lane.b32.xlu1 %v3344_v61, %s2887_s8 }
 0x422   : >> { %1445 = vrot.lane.b32.xlu1 %v3344_v61, %s2888_s16 }
 0x46c   : >> { %v1249_v26 = vpop.xlane.xlu1 %1248 }
 0x46d   : >> { %2543 = vrcp.f32 %v1249_v26 }
 0x46e   : >> { %2545 = vpow2.f32 %v1307_v35 }
 0x473   : >> { %v2544_v28 = vpop.eup %2543 }
 0x474   : >> { %v1251_v29 = vmul.f32 %v2544_v28, %v2542_v22  ;;  %v1435_v36 = vpop.xlane.xlu1 %1434  ;;  %v2546_v41 = vpop.eup %2545  ;;  %v2388_v22 = vld [vmem:[%s3251_s0] sm:$0xff] (%p1210_p10)  ;;  %s3645_s0 = scalar_lea.vmem (%p1210_p10), [#allocation8], %s3195_s18 }
 0x475   : >> { %v1436_v37 = vsub.f32 %v1429_v24, %v1435_v36  ;;  %v1309_v43 = vsel %vm1221_vm10, %v2546_v41, 0.0  ;;  %v2557_v24 = vld [vmem:[%s3643_s29] ss:$0 sm:$0xff] (%p1210_p10) }
 0x476   : >> { %v1252_v30 = vpack.c.bf16 %v1251_v29, %v1251_v29  ;;  %v3403_v29 = vld [vmem:[%s3256_s27] sm:$0xf] (%p1210_p10) }
 0x477   : >> { %v1437_v40 = vmul.f32 1.442695, %v1436_v37 }
 0x478   : >> { %2292 = vmatmul.msk.bf16.vlgmr.msra.gmra.mxu1 %vm1221_vm10, %v1252_v30  ;;  %v3406_v30 = vld [vmem:[%s3256_s27] sm:$0xf0] (%p1210_p10) }
 0x479   : >> { %2547 = vpow2.f32 %v1437_v40  ;;  %1542 = vmatpush.bf16.msra.mxu1 (%p1210_p10), %v2389_v21 }
 0x47d   : > { %1543 = vmatpush.bf16.msra.mxu1 (%p1210_p10), %v2388_v22 }
 0x47f   : >> { %v2548_v44 = vpop.eup %2547 }
 0x480   : >> { %v1439_v45 = vsel %vm1221_vm10, %v2548_v44, 0.0 }
 0x488   : >> { %2295 = vmatmul.msk.bf16.vlgmr.msrb.gmra.mxu1 %vm1221_vm10, %v1346_v14 }
 0x48c   : >> { %v1316_v46 = vpop.permute.xlu1 %1315 }
 0x48d   : >> { %v1321_v47 = vsel %vm1258_vm11, %v1316_v46, 0 }
 0x48e   : >> { %1330 = vmatpush.bf16.msra.mxu3 %v1321_v47 }
 0x494   : >> { %v1446_v48 = vpop.permute.xlu1 %1445 }
 0x495   : >> { %v1451_v49 = vsel %vm1258_vm11, %v1446_v48, 0 }
 0x496   : >> { %1460 = vmatpush.bf16.msrb.mxu2 %v1451_v49 }
 0x4f5   : >> { %v1271_v31 = vpop.f32.mrf.mxu1 }
 0x4f6   : >> { %1276 = vst.msk [vmem:[%s3373_s4] sm:$0xff] %vm1221_vm10, %v1271_v31  ;;  %v3409_v31 = vld [vmem:[%s3256_s27 + $0x8] sm:$0xf] (%p1210_p10) }
 0x4fd   : >> { %v1273_v34 = vpop.f32.mrf.mxu1 }
 0x4fe   : > { %v2558_v34 = vld [vmem:[%s3645_s0] ss:$0 sm:$0xff] (%p1210_p10) }
 0x505   : >> { %v1364_v38 = vpop.f32.mrf.mxu1 }
 0x506   : >> { %v1368_v39 = vsel %vm1221_vm10, %v1364_v38, -inf }
 0x507   : >> { %1369 = vmax.xlane.f32.xlu0 %v1368_v39 }
 0x50d   : >> { %v1366_v42 = vpop.f32.mrf.mxu1 }
 0x50f   : >> { %1310 = vadd.xlane.f32.xlu0 %v1309_v43 }
 0x517   : >> { %1440 = vadd.xlane.f32.xlu0 %v1439_v45 }
 0x57a   : >> { %v1370_v50 = vpop.xlane.xlu0 %1369 }
 0x57b   : >> { %v1371_v51 = vsub.f32 %v1364_v38, %v1370_v50 }
 0x57d   : >> { %v1372_v52 = vmul.f32 1.442695, %v1371_v51 }
 0x57f   : >> { %2549 = vpow2.f32 %v1372_v52 }
 0x582   : >> { %v1311_v53 = vpop.xlane.xlu0 %1310 }
 0x583   : >> { %2551 = vrcp.f32 %v1311_v53 }
 0x585   : >> { %v2550_v54 = vpop.eup %2549 }
 0x586   : >> { %v1374_v55 = vsel %vm1221_vm10, %v2550_v54, 0.0 }
 0x587   : >> { %1375 = vadd.xlane.f32.xlu0 %v1374_v55 }
 0x589   : >> { %v2552_v56 = vpop.eup %2551 }
 0x58a   : >> { %v1441_v57 = vpop.xlane.xlu0 %1440  ;;  %v1313_v58 = vmul.f32 %v2552_v56, %v2546_v41 }
 0x58b   : >> { %2553 = vrcp.f32 %v1441_v57 }
 0x58c   : >> { %v1314_v59 = vpack.c.bf16 %v1313_v58, %v1313_v58 }
 0x58e   : >> { %2294 = vmatmul.msk.bf16.vlgmr.msra.gmra.mxu3 %vm1221_vm10, %v1314_v59 }
 0x591   : >> { %v2554_v60 = vpop.eup %2553 }
 0x592   : >> { %v1443_v62 = vmul.f32 %v2554_v60, %v2548_v44 }
 0x594   : >> { %v1444_v63 = vpack.c.bf16 %v1443_v62, %v1443_v62 }
 0x596   : >> { %2298 = vmatmul.msk.bf16.vlgmr.msrb.gmra.mxu2 %vm1221_vm10, %v1444_v63 }
 0x59b   : >> { %1380 = vrot.lane.b32.xlu0 %v3344_v61, %s2889_s28 }
 0x5fa   : >> { %v1376_v0 = vpop.xlane.xlu0 %1375 }
 0x5fb   : >> { %2555 = vrcp.f32 %v1376_v0 }
 0x601   : >> { %v2556_v1 = vpop.eup %2555 }
 0x602   : >> { %v1378_v2 = vmul.f32 %v2556_v1, %v2550_v54 }
 0x604   : >> { %v1379_v6 = vpack.c.bf16 %v1378_v2, %v1378_v2 }
 0x60d   : >> { %v1381_v3 = vpop.permute.xlu0 %1380 }
 0x60e   : >> { %v1386_v4 = vsel %vm1258_vm11, %v1381_v3, 0 }
 0x60f   : >> { %1395 = vmatpush.bf16.msrb.mxu3 %v1386_v4 }
 0x611   : >> { %v1332_v7 = vpop.f32.mrf.mxu3 }
 0x612   : >> { %2296 = vmatmul.msk.bf16.vlgmr.msrb.gmra.mxu3 %vm1221_vm10, %v1379_v6  ;;  %1337 = vrot.lane.b32.xlu2 %v1332_v7, %s2890_s3 }
 0x619   : >> { %v1334_v8 = vpop.f32.mrf.mxu3  ;;  %v1462_v9 = vpop.f32.mrf.mxu2 }
 0x621   : >> { %v1464_v61 = vpop.f32.mrf.mxu2 }
 0x66c   : >> { %v1338_v10 = vpop.permute.xlu2 %1337 }
 0x66d   : >> { %1341 = vst.msk [vmem:[%s3373_s4] sm:$0xff] %vm1340_vm12, %v1338_v10 }
 0x695   : >> { %v1397_v11 = vpop.f32.mrf.mxu3 }
 0x696   : >> { %1402 = vrot.lane.b32.xlu1 %v1397_v11, %s2891_s19 }
 0x69d   : >> { %v1399_v12 = vpop.f32.mrf.mxu3 }
 0x69e   : >> { %1467 = vrot.lane.b32.xlu1 %v1462_v9, %s2892_s22 }
 0x708   : >> { %v1403_v14 = vpop.permute.xlu1 %1402 }
 0x709   : >> { %1406 = vst.msk [vmem:[%s3373_s4] sm:$0xff] %vm1405_vm13, %v1403_v14 }
 0x70d   : > { %1212 = sbr.rel (!%p1210_p10) target bundleno = 630 (0x276), region = 283 }
 0x710   : >> { %v1468_v15 = vpop.permute.xlu1 %1467 }
 0x711   : >> { %1471 = vst.msk [vmem:[%s3373_s4] sm:$0xff] %vm1470_vm14, %v1468_v15 }
 0x718   : > { %v1472_v18 = vld [vmem:[#allocation3] sm:$0xff]  ;;  %v1473_v19 = vld [vmem:[#allocation3 + $0x8] sm:$0xff] }
 0x719   : > { %v1474_v20 = vpack.c.bf16 %v1473_v19, %v1472_v18 }
 0x71b   : > { %2307 = vmatmul.msk.bf16.vlgmr.msra.gmra.mxu0 %vm1105_vm1, %v1474_v20 }
 0x798   : > { %v1507_v23 = vpop.f32.mrf.mxu0 }
 0x799   : > { %v1508_v26 = vadd.f32 %v2557_v24, %v1507_v23 }
 0x7a0   : > { %v1509_v25 = vpop.f32.mrf.mxu0 }
 0x7a1   : > { %v1510_v27 = vadd.f32 %v2557_v24, %v1509_v25 }
 0x7a3   : > { %v1512_v28 = vpack.c.bf16 %v1510_v27, %v1508_v26 }
 0x7a5   : > { %2316 = vmatmul.msk.bf16.vlgmr.msra.gmra.mxu1 %vm1105_vm1, %v1512_v28 }
 0x822   : > { %v1545_v35 = vpop.f32.mrf.mxu1 }
 0x823   : > { %v1546_v36 = vadd.f32 %v2558_v34, %v1545_v35 }
 0x825   : > { %1550 = vst.msk [vmem:[#allocation2] sm:$0xff] %vm1205_vm9, %v1546_v36 }
 0x82a   : > { %v1547_v37 = vpop.f32.mrf.mxu1 }
 0x82b   : > { %v1548_v38 = vadd.f32 %v2558_v34, %v1547_v37 }
 0x82d   : > { %1551 = vst.msk [vmem:[#allocation2 + $0x8] sm:$0xff] %vm1205_vm9, %v1548_v38 }
 0x82e LB: >> { %v2325_v39 = vor.u32 %v3412_v32, %v3409_v31  ;;  %v1617_v40 = vperm.slane %v3416_v33, 0  ;;  %v2321_v41 = vor.u32 %v3406_v30, %v3403_v29  ;;  %s2893_s27 = smov 64   ;;  %s2894_s5 = smov 32   ;;  %v1567_v42 = vpack.c.bf16 %v2864_v5, %v2864_v5  ;;  %s2868_s1 = sphi %s3425_s1, %s1562_s1   ;;  %v2864_v5 = vphi %v3308_v5, %v3647_v5  }
 0x82f   : >> { %1640 = vrot.lane.b32.xlu2 %v2864_v5, %s2894_s5  ;;  %s2317_s24 = sshll.u32 %s2868_s1, 3  ;;  %s2895_s14 = smov 96  }
 0x830   : >> { %1589 = vmatpush.bf16.msra.mxu0 %v2325_v39  ;;  %1618 = vrot.lane.b32.xlu0 %v1617_v40, %s2893_s27  ;;  %s1565_s12 = scalar_lea.vmem [#allocation2], %s2317_s24  ;;  %s1649_s7 = scalar_lea.vmem [#allocation3], %s2317_s24 }
 0x831   : >> { %s1562_s1 = sadd.s32 1, %s2868_s1  }
 0x832   : >> { %p1559_p5 = scmp.ge.s32.totalorder %s1562_s1, 2  }
 0x833   : > { %v2393_v25 = vld [vmem:[%s3265_s2 + $0x8] sm:$0xff] (%p1559_p5)  ;;  %v2392_v27 = vld [vmem:[%s3265_s2] sm:$0xff] (%p1559_p5)  ;;  %s3648_s8 = scalar_lea.vmem (%p1559_p5), %s3566_s11, %s3223_s6  ;;  %vm1786_vm11 = vcmask (%p1559_p5), 523264   ;;  %s3651_s6 = scalar_lea.vmem (%p1559_p5), [#allocation11], %s3195_s18 }
 0x834   : >> { %1590 = vmatpush.bf16.msra.mxu0 %v2321_v41  ;;  %v1566_v47 = vld [vmem:[%s1565_s12] sm:$0xff] }
 0x837   : >> { %2326 = vmatmul.msk.bf16.vlgmr.msra.gmra.mxu0 %vm1105_vm1, %v1567_v42 }
 0x838   : > { %1739 = vmatpush.bf16.msra.mxu0 (%p1559_p5), %v2393_v25 }
 0x83c   : > { %1740 = vmatpush.bf16.msra.mxu0 (%p1559_p5), %v2392_v27 }
 0x889   : >> { %v1641_v3 = vpop.permute.xlu2 %1640 }
 0x8a2   : >> { %v1619_v43 = vpop.permute.xlu0 %1618 }
 0x8b4   : >> { %v1592_v44 = vpop.f32.mrf.mxu0 }
 0x8b5   : >> { %v1621_v45 = vadd.f32 %v1619_v43, %v1592_v44  ;;  %v1596_v48 = vadd.f32 %v1592_v44, %v1566_v47 }
 0x8b7   : >> { %1623 = vrot.lane.b32.xlu0 %v1621_v45, %s2893_s27  ;;  %v2327_v49 = vmul.f32 -1.442695, %v1596_v48  ;;  %v2565_v45 = vld [vmem:[%s3648_s8] ss:$0 sm:$0xff] (%p1559_p5) }
 0x8b9   : >> { %2559 = vpow2.f32 %v2327_v49 }
 0x8bc   : >> { %v1594_v46 = vpop.f32.mrf.mxu0 }
 0x8bf   : >> { %v2560_v50 = vpop.eup %2559 }
 0x8c0   : >> { %v1600_v51 = vadd.f32 1.0, %v2560_v50  ;;  %v2566_v50 = vld [vmem:[%s1064_s21] ss:$0 sm:$0xff] (%p1559_p5) }
 0x8c2   : >> { %2561 = vrcp.f32 %v1600_v51  ;;  %v1612_v56 = vand.u32 2147483648, %v1600_v51  ;;  %vm1606_vm0 = vweird.f32 %v1600_v51  ;;  %v1610_v57 = vand.u32 2147483647, %v1600_v51 }
 0x8c4   : >> { %v1613_v59 = vor.u32 1.1754944e-38, %v1612_v56  ;;  %vm1611_vm3 = vcmp.eq.f32.partialorder %v1610_v57, 8.507059e+37  ;;  %v2395_v56 = vld [vmem:[%s3275_s30 + $0x8] sm:$0xff] (%p1559_p5)  ;;  %v2394_v57 = vld [vmem:[%s3275_s30] sm:$0xff] (%p1559_p5) }
 0x8c8   : >> { %v2562_v5 = vpop.eup %2561 }
 0x8c9   : >> { %v1602_v52 = vmul.f32 %v2562_v5, %v1600_v51  ;;  %vm1607_vm15 = vweird.f32 %v2562_v5 }
 0x8ca   : >> { %vm1608_vm2 = vmor %vm1606_vm0, %vm1607_vm15 }
 0x8cb   : >> { %v1603_v53 = vsub.f32 1.0, %v1602_v52 }
 0x8cd   : >> { %v1604_v54 = vmul.f32 %v2562_v5, %v1603_v53 }
 0x8cf   : >> { %v1605_v55 = vadd.f32 %v2562_v5, %v1604_v54  ;;  %v2397_v54 = vld [vmem:[%s3275_s30 + $0x18] sm:$0xff] (%p1559_p5) }
 0x8d0   : > { %1794 = vmatpush.bf16.msra.mxu1 (%p1559_p5), %v2397_v54 }
 0x8d1   : >> { %v1609_v58 = vsel %vm1608_vm2, %v2562_v5, %v1605_v55  ;;  %v2396_v55 = vld [vmem:[%s3275_s30 + $0x10] sm:$0xff] (%p1559_p5)  ;;  %s3513_s30 = smov (%p1559_p5), 0  }
 0x8d2   : >> { %v1614_v60 = vsel %vm1611_vm3, %v1613_v59, %v1609_v58  ;;  %v2567_v59 = vld [vmem:[%s1072_s17] ss:$0 sm:$0xff] (%p1559_p5)  ;;  %s3652_s17 = scalar_lea.vmem (%p1559_p5), [#allocation12], %s3195_s18 }
 0x8d3   : >> { %v1633_v4 = vsub.f32 1.0, %v1614_v60  ;;  %v1643_v7 = vmul.f32 %v1641_v3, %v1614_v60  ;;  %v2399_v3 = vld [vmem:[%s3280_s23 + $0x8] sm:$0xff] (%p1559_p5) }
 0x8d4   : > { %1795 = vmatpush.bf16.msra.mxu1 (%p1559_p5), %v2396_v55  ;;  %1836 = vmatpush.bf16.msra.mxu2 (%p1559_p5), %v2399_v3 }
 0x8d8   : > { %1796 = vmatpush.bf16.msra.mxu1 (%p1559_p5), %v2395_v56 }
 0x8dc   : > { %1797 = vmatpush.bf16.msra.mxu1 (%p1559_p5), %v2394_v57 }
 0x929   : >> { %v1624_v62 = vpop.permute.xlu0 %1623 }
 0x92a   : >> { %v1626_v63 = vmul.f32 %v1624_v62, %v1614_v60 }
 0x92c   : >> { %1628 = vrot.lane.b32.xlu1 %v1626_v63, %s2893_s27 }
 0x99e   : >> { %v1629_v0 = vpop.permute.xlu1 %1628 }
 0x99f   : >> { %v1631_v1 = vadd.f32 %v1629_v0, %v1566_v47 }
 0x9a1   : >> { %2563 = vtanh.f32 %v1631_v1 }
 0x9a7   : >> { %v2564_v2 = vpop.eup %2563 }
 0x9a8   : >> { %1635 = vrot.lane.b32.xlu1 %v2564_v2, %s2895_s14 }
 0xa1a   : >> { %v1636_v6 = vpop.permute.xlu1 %1635 }
 0xa1b   : >> { %v1638_v8 = vmul.f32 %v1636_v6, %v1633_v4  ;;  %v2398_v4 = vld [vmem:[%s3280_s23] sm:$0xff] (%p1559_p5) }
 0xa1c   : > { %1837 = vmatpush.bf16.msra.mxu2 (%p1559_p5), %v2398_v4 }
 0xa1d   : >> { %v1644_v9 = vadd.f32 %v1643_v7, %v1638_v8  ;;  %v2568_v7 = vld [vmem:[%s3651_s6] ss:$0 sm:$0xff] (%p1559_p5) }
 0xa1f   : >> { %1646 = vrot.lane.b32.xlu2 %v1644_v9, %s2895_s14 }
 0xa77   : > { %1561 = sbr.rel (!%p1559_p5) target bundleno = 2094 (0x82e), region = 294 }
 0xa79   : >> { %v3443_v5 = vpop.permute.xlu2 %1646  }
 0xa7a   : >> { %v3646_v61 = vmov %v3443_v5 }
 0xa7b   : >> { %1650 = vst.msk [vmem:[%s1649_s7] sm:$0xff] %vm1105_vm1, %v3646_v61  ;;  %v3647_v5 = vmov %v3646_v61 }
 0xa82   : > { %v1651_v10 = vld [vmem:[#allocation3] sm:$0xff]  ;;  %v1652_v12 = vld [vmem:[#allocation3 + $0x8] sm:$0xff] }
 0xa83   : > { %v1655_v11 = vsel %vm1105_vm1, %v1651_v10, 0.0  ;;  %v1658_v14 = vsel %vm1105_vm1, %v1652_v12, 0.0 }
 0xa84   : > { %1656 = vadd.xlane.f32.xlu0 %v1655_v11 }
 0xa8c   : > { %1659 = vadd.xlane.f32.xlu0 %v1658_v14 }
 0xaf7   : > { %v1657_v15 = vpop.xlane.xlu0 %1656 }
 0xaf8   : > { %v1661_v16 = vmul.f32 %v1657_v15, %v3311_v13  ;;  %v3491_v15 = vld [vmem:[%s3285_s15] sm:$0xf] }
 0xafa   : > { %v1663_v17 = vsub.f32 %v1651_v10, %v1661_v16  ;;  %v3494_v16 = vld [vmem:[%s3285_s15] sm:$0xf0] }
 0xafc   : > { %v1665_v18 = vmul.f32 %v1663_v17, %v1663_v17 }
 0xafe   : > { %v1667_v19 = vsel %vm1105_vm1, %v1665_v18, 0.0  ;;  %v3500_v18 = vld [vmem:[%s3285_s15 + $0x8] sm:$0xf0] }
 0xaff   : > { %1668 = vadd.xlane.f32.xlu1 %v1667_v19  ;;  %v1660_v20 = vpop.xlane.xlu0 %1659  ;;  %v3504_v19 = vld [vmem:[%s900_s26] sm:$0x1] }
 0xb00   : > { %v1662_v21 = vmul.f32 %v1660_v20, %v3311_v13  ;;  %v2569_v20 = vld [vmem:[%s3652_s17] ss:$0 sm:$0xff] }
 0xb02   : > { %v1664_v22 = vsub.f32 %v1652_v12, %v1662_v21 }
 0xb04   : > { %v1666_v23 = vmul.f32 %v1664_v22, %v1664_v22 }
 0xb06   : > { %v1670_v24 = vsel %vm1105_vm1, %v1666_v23, 0.0 }
 0xb07   : > { %1671 = vadd.xlane.f32.xlu1 %v1670_v24 }
 0xb72   : > { %v1669_v26 = vpop.xlane.xlu1 %1668 }
 0xb73   : > { %v1673_v28 = vmul.f32 %v1669_v26, %v3311_v13 }
 0xb75   : > { %v1675_v29 = vadd.f32 1e-05, %v1673_v28 }
 0xb77   : > { %2570 = vrsqrt.f32 %v1675_v29  ;;  %vm1683_vm5 = vweird.f32 %v1675_v29 }
 0xb7a   : > { %v1672_v30 = vpop.xlane.xlu1 %1671 }
 0xb7b   : > { %v1674_v31 = vmul.f32 %v1672_v30, %v3311_v13 }
 0xb7d   : > { %v2571_v32 = vpop.eup %2570  ;;  %v1676_v33 = vadd.f32 1e-05, %v1674_v31 }
 0xb7e   : > { %v1678_v34 = vmul.f32 %v2571_v32, %v1675_v29  ;;  %vm1684_vm4 = vweird.f32 %v2571_v32 }
 0xb7f   : > { %2572 = vrsqrt.f32 %v1676_v33  ;;  %vm1685_vm6 = vmor %vm1683_vm5, %vm1684_vm4  ;;  %vm1693_vm8 = vweird.f32 %v1676_v33 }
 0xb80   : > { %v1679_v35 = vmul.f32 %v2571_v32, %v1678_v34 }
 0xb82   : > { %v1680_v36 = vmul.f32 0.5, %v1679_v35 }
 0xb84   : > { %v1681_v37 = vsub.f32 1.5, %v1680_v36 }
 0xb85   : > { %v2573_v38 = vpop.eup %2572 }
 0xb86   : > { %v1682_v39 = vmul.f32 %v2571_v32, %v1681_v37  ;;  %v1688_v40 = vmul.f32 %v2573_v38, %v1676_v33  ;;  %vm1694_vm7 = vweird.f32 %v2573_v38 }
 0xb87   : > { %vm1695_vm10 = vmor %vm1693_vm8, %vm1694_vm7 }
 0xb88   : > { %v1689_v41 = vmul.f32 %v2573_v38, %v1688_v40  ;;  %v1686_v43 = vsel %vm1685_vm6, %v2571_v32, %v1682_v39 }
 0xb89   : > { %v1697_v13 = vmul.f32 %v1686_v43, %v1663_v17  ;;  %v3497_v17 = vld [vmem:[%s3285_s15 + $0x8] sm:$0xf] }
 0xb8a   : > { %v1690_v42 = vmul.f32 0.5, %v1689_v41 }
 0xb8b   : > { %v1702_v49 = vmul.f32 %v2565_v45, %v1697_v13 }
 0xb8c   : > { %v1691_v44 = vsub.f32 1.5, %v1690_v42 }
 0xb8d   : > { %v1707_v5 = vadd.f32 %v2566_v50, %v1702_v49 }
 0xb8e   : > { %v1692_v46 = vmul.f32 %v2573_v38, %v1691_v44 }
 0xb90   : > { %v1696_v47 = vsel %vm1695_vm10, %v2573_v38, %v1692_v46 }
 0xb91   : > { %v1698_v48 = vmul.f32 %v1696_v47, %v1664_v22 }
 0xb93   : > { %v1703_v51 = vmul.f32 %v2565_v45, %v1698_v48 }
 0xb95   : > { %v1708_v52 = vadd.f32 %v2566_v50, %v1703_v51 }
 0xb97   : > { %v1709_v53 = vpack.c.bf16 %v1708_v52, %v1707_v5 }
 0xb99   : > { %2336 = vmatmul.msk.bf16.vlgmr.msra.gmra.mxu0 %vm1105_vm1, %v1709_v53 }
 0xc16   : > { %v1742_v58 = vpop.f32.mrf.mxu0 }
 0xc17   : > { %v1743_v60 = vadd.f32 %v2567_v59, %v1742_v58 }
 0xc19   : > { %v1747_v0 = vmax.f32 %v1743_v60, 0.0 }
 0xc1e   : > { %v1744_v62 = vpop.f32.mrf.mxu0 }
 0xc1f   : > { %v1745_v63 = vadd.f32 %v2567_v59, %v1744_v62 }
 0xc21   : > { %v1748_v1 = vmax.f32 %v1745_v63, 0.0 }
 0xc23   : > { %v1749_v2 = vpack.c.bf16 %v1748_v1, %v1747_v0 }
 0xc25   : > { %2353 = vmatmul.msk.bf16.vlgmr.msra.gmra.mxu1 %vm1786_vm11, %v1749_v2 }
 0xca2   : > { %v1799_v6 = vpop.f32.mrf.mxu1 }
 0xca3   : > { %v1800_v8 = vadd.f32 %v2568_v7, %v1799_v6 }
 0xca5   : > { %v1804_v11 = vmax.f32 %v1800_v8, 0.0 }
 0xcaa   : > { %v1801_v9 = vpop.f32.mrf.mxu1 }
 0xcab   : > { %v1802_v10 = vadd.f32 %v2568_v7, %v1801_v9 }
 0xcad   : > { %v1805_v12 = vmax.f32 %v1802_v10, 0.0 }
 0xcaf   : > { %v1806_v14 = vpack.c.bf16 %v1805_v12, %v1804_v11 }
 0xcb1   : > { %2362 = vmatmul.msk.bf16.vlgmr.msra.gmra.mxu2 %vm1105_vm1, %v1806_v14 }
 0xd34   : > { %v1839_v21 = vpop.f32.mrf.mxu2 }
 0xd35   : > { %v1840_v22 = vadd.f32 %v2569_v20, %v1839_v21 }
 0xd37   : > { %1844 = vst.msk [vmem:[#allocation2] sm:$0xff] %vm1205_vm9, %v1840_v22 }
 0xd3c   : > { %v1841_v23 = vpop.f32.mrf.mxu2 }
 0xd3d   : > { %v1842_v24 = vadd.f32 %v2569_v20, %v1841_v23 }
 0xd3f   : > { %1845 = vst.msk [vmem:[#allocation2 + $0x8] sm:$0xff] %vm1205_vm9, %v1842_v24 }
 0xd40 LB: >> { %v2371_v25 = vor.u32 %v3500_v18, %v3497_v17  ;;  %v1911_v26 = vperm.slane %v3504_v19, 0  ;;  %v2367_v27 = vor.u32 %v3494_v16, %v3491_v15  ;;  %s2896_s18 = smov 64   ;;  %s2897_s23 = smov 32   ;;  %v1861_v28 = vpack.c.bf16 %v2872_v61, %v2872_v61  ;;  %s2876_s30 = sphi %s3513_s30, %s1856_s30   ;;  %v2872_v61 = vphi %v3646_v61, %v1941_v61  }
 0xd41   : >> { %1934 = vrot.lane.b32.xlu2 %v2872_v61, %s2897_s23  ;;  %s2363_s15 = sshll.u32 %s2876_s30, 3  ;;  %s2898_s22 = smov 96  }
 0xd42   : >> { %1883 = vmatpush.bf16.msra.mxu0 %v2371_v25  ;;  %1912 = vrot.lane.b32.xlu0 %v1911_v26, %s2896_s18  ;;  %s1859_s26 = scalar_lea.vmem [#allocation2], %s2363_s15  ;;  %s3653_s0 = sld [smem:[#allocation41_spill]] }
 0xd43   : >> { %s1856_s30 = sadd.s32 1, %s2876_s30  }
 0xd44   : >> { %p1853_p11 = scmp.ge.s32.totalorder %s1856_s30, 2  }
 0xd46   : >> { %1884 = vmatpush.bf16.msra.mxu0 %v2367_v27  ;;  %v1860_v33 = vld [vmem:[%s1859_s26] sm:$0xff] }
 0xd48   : >> { %s1943_s1 = scalar_lea.vmem %s3653_s0, %s2363_s15 }
 0xd49   : >> { %2372 = vmatmul.msk.bf16.vlgmr.msra.gmra.mxu0 %vm1105_vm1, %v1861_v28 }
 0xd9b   : >> { %v1935_v51 = vpop.permute.xlu2 %1934 }
 0xdb4   : >> { %v1913_v29 = vpop.permute.xlu0 %1912 }
 0xdc6   : >> { %v1886_v30 = vpop.f32.mrf.mxu0 }
 0xdc7   : >> { %v1915_v31 = vadd.f32 %v1913_v29, %v1886_v30  ;;  %v1890_v34 = vadd.f32 %v1886_v30, %v1860_v33 }
 0xdc9   : >> { %1917 = vrot.lane.b32.xlu0 %v1915_v31, %s2896_s18  ;;  %v2373_v35 = vmul.f32 -1.442695, %v1890_v34 }
 0xdcb   : >> { %2574 = vpow2.f32 %v2373_v35 }
 0xdce   : >> { %v1888_v32 = vpop.f32.mrf.mxu0 }
 0xdd1   : >> { %v2575_v36 = vpop.eup %2574 }
 0xdd2   : >> { %v1894_v37 = vadd.f32 1.0, %v2575_v36 }
 0xdd4   : >> { %2576 = vrcp.f32 %v1894_v37  ;;  %v1906_v42 = vand.u32 2147483648, %v1894_v37  ;;  %vm1900_vm12 = vweird.f32 %v1894_v37  ;;  %v1904_v43 = vand.u32 2147483647, %v1894_v37 }
 0xdd6   : >> { %v1907_v13 = vor.u32 1.1754944e-38, %v1906_v42  ;;  %vm1905_vm14 = vcmp.eq.f32.partialorder %v1904_v43, 8.507059e+37 }
 0xdda   : >> { %v2577_v61 = vpop.eup %2576 }
 0xddb   : >> { %v1896_v38 = vmul.f32 %v2577_v61, %v1894_v37  ;;  %vm1901_vm9 = vweird.f32 %v2577_v61 }
 0xddc   : >> { %vm1902_vm13 = vmor %vm1900_vm12, %vm1901_vm9 }
 0xddd   : >> { %v1897_v39 = vsub.f32 1.0, %v1896_v38 }
 0xddf   : >> { %v1898_v40 = vmul.f32 %v2577_v61, %v1897_v39 }
 0xde1   : >> { %v1899_v41 = vadd.f32 %v2577_v61, %v1898_v40 }
 0xde3   : >> { %v1903_v44 = vsel %vm1902_vm13, %v2577_v61, %v1899_v41 }
 0xde4   : >> { %v1908_v45 = vsel %vm1905_vm14, %v1907_v13, %v1903_v44 }
 0xde5   : >> { %v1927_v5 = vsub.f32 1.0, %v1908_v45  ;;  %v1937_v53 = vmul.f32 %v1935_v51, %v1908_v45 }
 0xe3b   : >> { %v1918_v46 = vpop.permute.xlu0 %1917 }
 0xe3c   : >> { %v1920_v47 = vmul.f32 %v1918_v46, %v1908_v45 }
 0xe3e   : >> { %1922 = vrot.lane.b32.xlu1 %v1920_v47, %s2896_s18 }
 0xeb0   : >> { %v1923_v48 = vpop.permute.xlu1 %1922 }
 0xeb1   : >> { %v1925_v49 = vadd.f32 %v1923_v48, %v1860_v33 }
 0xeb3   : >> { %2578 = vtanh.f32 %v1925_v49 }
 0xeb9   : >> { %v2579_v50 = vpop.eup %2578 }
 0xeba   : >> { %1929 = vrot.lane.b32.xlu1 %v2579_v50, %s2898_s22 }
 0xf2c   : >> { %v1930_v52 = vpop.permute.xlu1 %1929 }
 0xf2d   : >> { %v1932_v54 = vmul.f32 %v1930_v52, %v1927_v5 }
 0xf2f   : >> { %v1938_v55 = vadd.f32 %v1937_v53, %v1932_v54 }
 0xf31   : >> { %1940 = vrot.lane.b32.xlu2 %v1938_v55, %s2898_s22 }
 0xf88   : > { %1855 = sbr.rel (!%p1853_p11) target bundleno = 3392 (0xd40), region = 305 }
 0xf8b   : >> { %v1941_v61 = vpop.permute.xlu2 %1940  }
 0xf8c   : >> { %1944 = vst.msk [vmem:[%s1943_s1] sm:$0xff] %vm1105_vm1, %v1941_v61 }
 0xf8d PF: > { %s3654_s27 = sld [smem:[#allocation20_spill]]  ;;  %s3657_s2 = smov %s2848_s25 }
 0xf8e   : > { %s3655_s5 = sld [smem:[#allocation19_spill]] }
 0xf8f   : > { %s3656_s26 = sld [smem:[#allocation21_spill]] }
 0xf93   : > { %p40_p12 = scmp.ge.s32.totalorder %s3654_s27, 4  }
 0xf94   : > { %s3658_s25 = smov %s3655_s5 }
 0xf95   :  { %42 = sbr.rel (!%p40_p12) target bundleno = 30 (0x1e), region = 316 }
 0xf9a   :  { %1956 = vsyncpa [#allocation5], 1 }
 0xf9b   :  { %1958 = vsyncpa [#allocation5 + $0x1], 1 }
 0xf9c   :  { %1959 = vsyncpa [#allocation7], 1 }
 0xf9d   :  { %1961 = vsyncpa [#allocation7 + $0x1], 1 }
 0xf9e   :  { %1962 = vsyncpa [#allocation10], 1 }
 0xf9f   :  { %1964 = vsyncpa [#allocation10 + $0x1], 1 }
 0xfa0   :  { %1965 = vsyncpa [#allocation13], 1 }
 0xfa1   :  { %1967 = vsyncpa [#allocation13 + $0x1], 1 }

</bundles_post_ra>
